<compile_context>
chip_gen: v7x
topology: tpu7x:2x2x1
jax: 0.10.0
libtpu: 0.0.40
codegen_flags: <defaults>
</compile_context>

<pallas_src>
import math

import jax
import jax.numpy as jnp
from jax.experimental import pallas as pl
from jax.experimental.pallas import tpu as pltpu


def _ru8(n):
    return (n + 7) // 8 * 8


def _pad_rows(a):
    pad = _ru8(a.shape[0]) - a.shape[0]
    if pad:
        a = jnp.concatenate([a, jnp.zeros((pad, a.shape[1]), a.dtype)], axis=0)
    return a


# ----------------------------- fused kernel -------------------------------- #

def vae_kernel(x_ref, c_ref, eps_ref,
               enc_gru_ref, enc_head_ref, dec_gru_ref, dec_rec_ref,
               recon_ref, head_ref, hs_ref):
    f32 = jnp.float32
    BB = c_ref.shape[0]                 # batch tile
    Din = x_ref.shape[1]
    T = x_ref.shape[0] // BB
    L1 = eps_ref.shape[1]
    emb = c_ref.shape[1]
    H1 = enc_head_ref.shape[0] - 1
    H2 = dec_rec_ref.shape[0] - 1
    S = recon_ref.shape[0] // BB

    # -------------------- encoder GRU over T steps -------------------- #
    o_wh = _ru8(Din)
    o_b = o_wh + _ru8(H1)
    e_wi3 = enc_gru_ref[0:Din, :]
    e_wh3 = enc_gru_ref[o_wh:o_wh + H1, :]
    e_bgi = enc_gru_ref[o_b:o_b + 1, :]                          # bi3 + bh_{r,z}
    e_bhn = enc_gru_ref[o_b + 1:o_b + 2, 2 * H1:3 * H1]          # bh_n only

    # Input-gate contributions for all timesteps/batch at once: [T*BB, 3*H1].
    gi_all = jnp.dot(x_ref[...], e_wi3, preferred_element_type=f32) + e_bgi

    h = jnp.zeros((BB, H1), f32)
    for t in range(T):                  # static unroll (T small & static)
        gi_t = gi_all[t * BB:(t + 1) * BB, :]
        gh = jnp.dot(h, e_wh3, preferred_element_type=f32)       # [BB, 3*H1]
        r = jax.nn.sigmoid(gi_t[:, 0:H1] + gh[:, 0:H1])
        zg = jax.nn.sigmoid(gi_t[:, H1:2 * H1] + gh[:, H1:2 * H1])
        n = jnp.tanh(gi_t[:, 2 * H1:3 * H1] + r * (gh[:, 2 * H1:3 * H1] + e_bhn))
        h = (1.0 - zg) * n + zg * h

    # -------------------- mu/var heads + reparameterize -------------------- #
    whead = enc_head_ref[0:H1, :]
    bhead = enc_head_ref[H1:H1 + 1, :]
    head = jnp.dot(h, whead, preferred_element_type=f32) + bhead  # [BB, 2*L1]
    head_ref[...] = head                                          # mu | logvar fused
    mu = head[:, 0:L1]
    logvar = head[:, L1:2 * L1]
    z = mu + eps_ref[...] * jnp.exp(0.5 * logvar)

    # -------------------- decoder (fc folded into input-gate weights) ------ #
    oW2 = _ru8(L1)
    oWh = oW2 + _ru8(emb)
    ob = oWh + _ru8(H2)
    d_W1 = dec_gru_ref[0:L1, :]                                   # wfc_z @ wi3
    d_W2 = dec_gru_ref[oW2:oW2 + emb, :]                          # wfc_c @ wi3
    d_wh3 = dec_gru_ref[oWh:oWh + H2, :]
    d_bgi = dec_gru_ref[ob:ob + 1, :]                             # bfc@wi3 + bi3 + bh_{r,z}
    d_bhn = dec_gru_ref[ob + 1:ob + 2, 2 * H2:3 * H2]             # bh_n only

    gi = (jnp.dot(z, d_W1, preferred_element_type=f32)
          + jnp.dot(c_ref[...], d_W2, preferred_element_type=f32)
          + d_bgi)                                                # [BB, 3*H2], loop-invariant
    gi_r = gi[:, 0:H2]
    gi_z = gi[:, H2:2 * H2]
    gi_n = gi[:, 2 * H2:3 * H2]

    h2 = jnp.zeros((BB, H2), f32)
    for s in range(S):                  # static unroll (S small & static)
        gh = jnp.dot(h2, d_wh3, preferred_element_type=f32)       # [BB, 3*H2]
        r = jax.nn.sigmoid(gi_r + gh[:, 0:H2])
        zg = jax.nn.sigmoid(gi_z + gh[:, H2:2 * H2])
        n = jnp.tanh(gi_n + r * (gh[:, 2 * H2:3 * H2] + d_bhn))
        h2 = (1.0 - zg) * n + zg * h2
        hs_ref[s * BB:(s + 1) * BB, :] = h2                       # off-critical-path store

    wrec = dec_rec_ref[0:H2, :]
    brec = dec_rec_ref[H2:H2 + 1, :]
    recon_ref[...] = jnp.dot(hs_ref[...], wrec, preferred_element_type=f32) + brec


# ----------------------------- weight packing ------------------------------- #

def pack_params(params):
    enc, dec = params["enc"], params["dec"]
    H1 = enc["wh3"].shape[0]
    H2 = dec["wh3"].shape[0]

    e_bh = enc["bh3"]
    e_bh_rz = e_bh.at[:, 2 * H1:].set(0.0)
    e_bh_n = jnp.zeros_like(e_bh).at[:, 2 * H1:].set(e_bh[:, 2 * H1:])
    enc_gru = jnp.concatenate(
        [_pad_rows(enc["wi3"]), _pad_rows(enc["wh3"]),
         enc["bi3"] + e_bh_rz, e_bh_n], axis=0)
    enc_head = jnp.concatenate([enc["whead"], enc["bhead"]], axis=0)

    # Fold Decoder.fc into the input-gate weights (exact up to f32 rounding).
    W1 = dec["wfc_z"] @ dec["wi3"]
    W2 = dec["wfc_c"] @ dec["wi3"]
    b_in = dec["bfc"] @ dec["wi3"] + dec["bi3"]
    d_bh = dec["bh3"]
    d_bh_rz = d_bh.at[:, 2 * H2:].set(0.0)
    d_bh_n = jnp.zeros_like(d_bh).at[:, 2 * H2:].set(d_bh[:, 2 * H2:])
    dec_gru = jnp.concatenate(
        [_pad_rows(W1), _pad_rows(W2), _pad_rows(dec["wh3"]),
         b_in + d_bh_rz, d_bh_n], axis=0)
    dec_rec = jnp.concatenate([dec["wrec"], dec["brec"]], axis=0)
    return enc_gru, enc_head, dec_gru, dec_rec


# ----------------------------- wrapper ------------------------------------- #

def vae_forward(x, c, seq_len, params, eps, *, block_b=8):
    """x: [B,T,Din], c: [B,emb], eps: [B,L1] -> recon [B,S,Dout], mu/var [B,L1]."""
    B, T, Din = x.shape
    emb = c.shape[1]
    L1 = eps.shape[1]
    H2 = params["dec"]["wh3"].shape[0]
    Dout = params["dec"]["wrec"].shape[1]

    if B % block_b != 0 or block_b % 8 != 0:
        block_b = B
    nb = B // block_b

    # Batch-tile-major, time-major within a tile: row = i*T*BB + t*BB + j.
    x_p = (x.reshape(nb, block_b, T, Din)
             .transpose(0, 2, 1, 3)
             .reshape(nb * T * block_b, Din))

    enc_gru, enc_head, dec_gru, dec_rec = pack_params(params)

    recon_flat, head = pl.pallas_call(
        vae_kernel,
        out_shape=(jax.ShapeDtypeStruct((seq_len * B, Dout), jnp.float32),
                   jax.ShapeDtypeStruct((B, 2 * L1), jnp.float32)),
        grid_spec=pltpu.PrefetchScalarGridSpec(
            num_scalar_prefetch=0,
            grid=(nb,),
            in_specs=[
                pl.BlockSpec((T * block_b, Din), lambda i: (i, 0)),
                pl.BlockSpec((block_b, emb), lambda i: (i, 0)),
                pl.BlockSpec((block_b, L1), lambda i: (i, 0)),
                pl.BlockSpec(enc_gru.shape, lambda i: (0, 0)),
                pl.BlockSpec(enc_head.shape, lambda i: (0, 0)),
                pl.BlockSpec(dec_gru.shape, lambda i: (0, 0)),
                pl.BlockSpec(dec_rec.shape, lambda i: (0, 0)),
            ],
            out_specs=(
                pl.BlockSpec((seq_len * block_b, Dout), lambda i: (i, 0)),
                pl.BlockSpec((block_b, 2 * L1), lambda i: (i, 0)),
            ),
            scratch_shapes=[pltpu.VMEM((seq_len * block_b, H2), jnp.float32)],
        ),
        compiler_params=pltpu.CompilerParams(
            dimension_semantics=("parallel",)),
    )(x_p, c, eps, enc_gru, enc_head, dec_gru, dec_rec)

    recon = (recon_flat.reshape(nb, seq_len, block_b, Dout)
                       .transpose(0, 2, 1, 3)
                       .reshape(B, seq_len, Dout))
    mu = head[:, :L1]
    var = head[:, L1:]
    return recon, mu, var


# ----------------------------- pure-JAX reference --------------------------- #

def _gru_step(h, gi_t, wh3, bh3, H):
    gh = h @ wh3 + bh3
    r = jax.nn.sigmoid(gi_t[:, 0:H] + gh[:, 0:H])
    zg = jax.nn.sigmoid(gi_t[:, H:2 * H] + gh[:, H:2 * H])
    n = jnp.tanh(gi_t[:, 2 * H:3 * H] + r * gh[:, 2 * H:3 * H])
    return (1.0 - zg) * n + zg * h


def vae_reference(x, c, seq_len, params, eps):
    enc, dec = params["enc"], params["dec"]
    B, T, _ = x.shape
    H1 = enc["wh3"].shape[0]
    H2 = dec["wh3"].shape[0]
    L1 = enc["bhead"].shape[1] // 2

    h = jnp.zeros((B, H1), jnp.float32)
    for t in range(T):
        gi_t = x[:, t, :] @ enc["wi3"] + enc["bi3"]
        h = _gru_step(h, gi_t, enc["wh3"], enc["bh3"], H1)
    head = h @ enc["whead"] + enc["bhead"]
    mu, var = head[:, :L1], head[:, L1:]
    z = mu + eps * jnp.exp(0.5 * var)

    x0 = z @ dec["wfc_z"] + c @ dec["wfc_c"] + dec["bfc"]
    gi = x0 @ dec["wi3"] + dec["bi3"]
    h2 = jnp.zeros((B, H2), jnp.float32)
    hs = []
    for _ in range(seq_len):
        h2 = _gru_step(h2, gi, dec["wh3"], dec["bh3"], H2)
        hs.append(h2)
    recon = jnp.stack(hs, axis=1) @ dec["wrec"] + dec["brec"]
    return recon, mu, var


# ----------------------------- params -------------------------------------- #

def _uniform(key, shape, bound):
    return jax.random.uniform(key, shape, jnp.float32, -bound, bound)


def init_gru_fused(key, d_in, h):
    ks = jax.random.split(key, 4)
    b = 1.0 / math.sqrt(h)
    return {"wi3": _uniform(ks[0], (d_in, 3 * h), b),
            "wh3": _uniform(ks[1], (h, 3 * h), b),
            "bi3": _uniform(ks[2], (1, 3 * h), b),
            "bh3": _uniform(ks[3], (1, 3 * h), b)}


def init_vae(key, input_dim, h1_dim, l1_dim, embedding_dim, h2_dim, output_dim):
    l2_dim = l1_dim + embedding_dim
    k_enc, k_head, k_fc, k_dec, k_rec = jax.random.split(key, 5)

    enc = init_gru_fused(k_enc, input_dim, h1_dim)
    kh1, kh2 = jax.random.split(k_head)
    bh = 1.0 / math.sqrt(h1_dim)
    enc["whead"] = _uniform(kh1, (h1_dim, 2 * l1_dim), bh)   # [mu | var] fused head
    enc["bhead"] = _uniform(kh2, (1, 2 * l1_dim), bh)

    dec = init_gru_fused(k_dec, h2_dim, h2_dim)
    kf1, kf2, kf3 = jax.random.split(k_fc, 3)
    bf = 1.0 / math.sqrt(l2_dim)
    dec["wfc_z"] = _uniform(kf1, (l1_dim, h2_dim), bf)         # fc weight, z part
    dec["wfc_c"] = _uniform(kf2, (embedding_dim, h2_dim), bf)  # fc weight, c part
    dec["bfc"] = _uniform(kf3, (1, h2_dim), bf)
    kr1, kr2 = jax.random.split(k_rec)
    br = 1.0 / math.sqrt(h2_dim)
    dec["wrec"] = _uniform(kr1, (h2_dim, output_dim), br)
    dec["brec"] = _uniform(kr2, (1, output_dim), br)

    return {"enc": enc, "dec": dec}


# ------------------------------- main --------------------------------------- #

if __name__ == "__main__":
    input_dim, h1_dim, l1_dim = 6, 32, 8
    embedding_dim, h2_dim, output_dim = 4, 32, 6
    T, seq_len, batch = 10, 8, 16

    key = jax.random.PRNGKey(0)
    k_params, k_x, k_c, k_eps = jax.random.split(key, 4)

    params = init_vae(k_params, input_dim, h1_dim, l1_dim,
                      embedding_dim, h2_dim, output_dim)
    x = jax.random.normal(k_x, (batch, T, input_dim), dtype=jnp.float32)
    c = jax.random.normal(k_c, (batch, embedding_dim), dtype=jnp.float32)
    # TODO(synk): torch.randn_like is nondeterministic; eps uses a fixed PRNG key here.
    eps = jax.random.normal(k_eps, (batch, l1_dim), dtype=jnp.float32)

    recon_x, mu, var = vae_forward(x, c, seq_len, params, eps, block_b=8)
    jax.block_until_ready((recon_x, mu, var))

    assert recon_x.shape == (batch, seq_len, output_dim)
    assert mu.shape == (batch, l1_dim) and var.shape == (batch, l1_dim)

    # Correctness check against a pure-JAX reference of the original (un-folded) math.
    ref_recon, ref_mu, ref_var = vae_reference(x, c, seq_len, params, eps)
    assert jnp.allclose(recon_x, ref_recon, atol=1e-4, rtol=1e-4)
    assert jnp.allclose(mu, ref_mu, atol=1e-4, rtol=1e-4)
    assert jnp.allclose(var, ref_var, atol=1e-4, rtol=1e-4)

    print("KERNEL_OK")
</pallas_src>

<mosaic_0001>
module attributes {stable_mosaic.version = 11 : i64} {
  func.func @vae_kernel(%arg0: i32, %arg1: memref<80x6xf32, #tpu.memory_space<vmem>>, %arg2: memref<8x4xf32, #tpu.memory_space<vmem>>, %arg3: memref<8x8xf32, #tpu.memory_space<vmem>>, %arg4: memref<42x96xf32, #tpu.memory_space<vmem>>, %arg5: memref<33x16xf32, #tpu.memory_space<vmem>>, %arg6: memref<50x96xf32, #tpu.memory_space<vmem>>, %arg7: memref<33x6xf32, #tpu.memory_space<vmem>>, %arg8: memref<64x6xf32, #tpu.memory_space<vmem>>, %arg9: memref<8x16xf32, #tpu.memory_space<vmem>>, %arg10: memref<64x32xf32, #tpu.memory_space<vmem>>) attributes {dimension_semantics = [#tpu.dimension_semantics<parallel>], iteration_bounds = array<i64: 2>, scalar_prefetch = 0 : i64, scratch_operands = 1 : i64, tpu.core_type = #tpu.core_type<tc>, window_params = [{transform_indices = @transform_0, window_bounds = array<i64: 80, 6>}, {transform_indices = @transform_1, window_bounds = array<i64: 8, 4>}, {transform_indices = @transform_2, window_bounds = array<i64: 8, 8>}, {pipeline_mode = #tpu.pipeline_mode<synchronous>, transform_indices = @transform_3, window_bounds = array<i64: 42, 96>}, {pipeline_mode = #tpu.pipeline_mode<synchronous>, transform_indices = @transform_4, window_bounds = array<i64: 33, 16>}, {pipeline_mode = #tpu.pipeline_mode<synchronous>, transform_indices = @transform_5, window_bounds = array<i64: 50, 96>}, {pipeline_mode = #tpu.pipeline_mode<synchronous>, transform_indices = @transform_6, window_bounds = array<i64: 33, 6>}, {transform_indices = @transform_7, window_bounds = array<i64: 64, 6>}, {transform_indices = @transform_8, window_bounds = array<i64: 8, 16>}]} {
    %c0 = arith.constant 0 : index
    %c0_0 = arith.constant 0 : index
    %0 = vector.load %arg4[%c0, %c0_0] : memref<42x96xf32, #tpu.memory_space<vmem>>, vector<6x96xf32>
    %c8 = arith.constant 8 : index
    %c0_1 = arith.constant 0 : index
    %1 = vector.load %arg4[%c8, %c0_1] : memref<42x96xf32, #tpu.memory_space<vmem>>, vector<32x96xf32>
    %c40 = arith.constant 40 : index
    %c0_2 = arith.constant 0 : index
    %2 = vector.load %arg4[%c40, %c0_2] : memref<42x96xf32, #tpu.memory_space<vmem>>, vector<1x96xf32>
    %c41 = arith.constant 41 : index
    %c64 = arith.constant 64 : index
    %3 = vector.load %arg4[%c41, %c64] : memref<42x96xf32, #tpu.memory_space<vmem>>, vector<1x32xf32>
    %c0_3 = arith.constant 0 : index
    %c0_4 = arith.constant 0 : index
    %4 = vector.load %arg1[%c0_3, %c0_4] : memref<80x6xf32, #tpu.memory_space<vmem>>, vector<80x6xf32>
    %cst = arith.constant dense<0.000000e+00> : vector<80x96xf32>
    %5 = tpu.matmul %4, %0, %cst {dimension_numbers = #tpu.dot_dimension_numbers<[1], [0], [0], [1], [0, 0, 1, 1], [], []>} : vector<80x6xf32>, vector<6x96xf32>, vector<80x96xf32> -> vector<80x96xf32>
    %6 = vector.broadcast %2 : vector<1x96xf32> to vector<80x96xf32>
    %7 = arith.addf %5, %6 : vector<80x96xf32>
    %cst_5 = arith.constant 0.000000e+00 : f32
    %8 = vector.broadcast %cst_5 : f32 to vector<8x32xf32>
    %9 = vector.extract_strided_slice %7 {offsets = [0, 0], sizes = [8, 96], strides = [1, 1]} : vector<80x96xf32> to vector<8x96xf32>
    %cst_6 = arith.constant dense<0.000000e+00> : vector<8x96xf32>
    %10 = tpu.matmul %8, %1, %cst_6 {dimension_numbers = #tpu.dot_dimension_numbers<[1], [0], [0], [1], [0, 0, 1, 1], [], []>} : vector<8x32xf32>, vector<32x96xf32>, vector<8x96xf32> -> vector<8x96xf32>
    %11 = vector.extract_strided_slice %9 {offsets = [0, 0], sizes = [8, 32], strides = [1, 1]} : vector<8x96xf32> to vector<8x32xf32>
    %12 = vector.extract_strided_slice %10 {offsets = [0, 0], sizes = [8, 32], strides = [1, 1]} : vector<8x96xf32> to vector<8x32xf32>
    %13 = arith.addf %11, %12 : vector<8x32xf32>
    %14 = arith.negf %13 : vector<8x32xf32>
    %15 = math.exp %14 : vector<8x32xf32>
    %cst_7 = arith.constant 1.000000e+00 : f32
    %16 = vector.broadcast %cst_7 : f32 to vector<8x32xf32>
    %17 = arith.addf %16, %15 : vector<8x32xf32>
    %18 = arith.divf %16, %17 : vector<8x32xf32>
    %19 = vector.extract_strided_slice %9 {offsets = [0, 32], sizes = [8, 32], strides = [1, 1]} : vector<8x96xf32> to vector<8x32xf32>
    %20 = vector.extract_strided_slice %10 {offsets = [0, 32], sizes = [8, 32], strides = [1, 1]} : vector<8x96xf32> to vector<8x32xf32>
    %21 = arith.addf %19, %20 : vector<8x32xf32>
    %22 = arith.negf %21 : vector<8x32xf32>
    %23 = math.exp %22 : vector<8x32xf32>
    %cst_8 = arith.constant 1.000000e+00 : f32
    %24 = vector.broadcast %cst_8 : f32 to vector<8x32xf32>
    %25 = arith.addf %24, %23 : vector<8x32xf32>
    %26 = arith.divf %24, %25 : vector<8x32xf32>
    %27 = vector.extract_strided_slice %9 {offsets = [0, 64], sizes = [8, 32], strides = [1, 1]} : vector<8x96xf32> to vector<8x32xf32>
    %28 = vector.extract_strided_slice %10 {offsets = [0, 64], sizes = [8, 32], strides = [1, 1]} : vector<8x96xf32> to vector<8x32xf32>
    %29 = vector.broadcast %3 : vector<1x32xf32> to vector<8x32xf32>
    %30 = arith.addf %28, %29 : vector<8x32xf32>
    %31 = arith.mulf %18, %30 : vector<8x32xf32>
    %32 = arith.addf %27, %31 : vector<8x32xf32>
    %33 = math.tanh %32 : vector<8x32xf32>
    %cst_9 = arith.constant 1.000000e+00 : f32
    %34 = vector.broadcast %cst_9 : f32 to vector<8x32xf32>
    %35 = arith.subf %34, %26 : vector<8x32xf32>
    %36 = arith.mulf %35, %33 : vector<8x32xf32>
    %37 = arith.mulf %26, %8 : vector<8x32xf32>
    %38 = arith.addf %36, %37 : vector<8x32xf32>
    %39 = vector.extract_strided_slice %7 {offsets = [8, 0], sizes = [8, 96], strides = [1, 1]} : vector<80x96xf32> to vector<8x96xf32>
    %cst_10 = arith.constant dense<0.000000e+00> : vector<8x96xf32>
    %40 = tpu.matmul %38, %1, %cst_10 {dimension_numbers = #tpu.dot_dimension_numbers<[1], [0], [0], [1], [0, 0, 1, 1], [], []>} : vector<8x32xf32>, vector<32x96xf32>, vector<8x96xf32> -> vector<8x96xf32>
    %41 = vector.extract_strided_slice %39 {offsets = [0, 0], sizes = [8, 32], strides = [1, 1]} : vector<8x96xf32> to vector<8x32xf32>
    %42 = vector.extract_strided_slice %40 {offsets = [0, 0], sizes = [8, 32], strides = [1, 1]} : vector<8x96xf32> to vector<8x32xf32>
    %43 = arith.addf %41, %42 : vector<8x32xf32>
    %44 = arith.negf %43 : vector<8x32xf32>
    %45 = math.exp %44 : vector<8x32xf32>
    %cst_11 = arith.constant 1.000000e+00 : f32
    %46 = vector.broadcast %cst_11 : f32 to vector<8x32xf32>
    %47 = arith.addf %46, %45 : vector<8x32xf32>
    %48 = arith.divf %46, %47 : vector<8x32xf32>
    %49 = vector.extract_strided_slice %39 {offsets = [0, 32], sizes = [8, 32], strides = [1, 1]} : vector<8x96xf32> to vector<8x32xf32>
    %50 = vector.extract_strided_slice %40 {offsets = [0, 32], sizes = [8, 32], strides = [1, 1]} : vector<8x96xf32> to vector<8x32xf32>
    %51 = arith.addf %49, %50 : vector<8x32xf32>
    %52 = arith.negf %51 : vector<8x32xf32>
    %53 = math.exp %52 : vector<8x32xf32>
    %cst_12 = arith.constant 1.000000e+00 : f32
    %54 = vector.broadcast %cst_12 : f32 to vector<8x32xf32>
    %55 = arith.addf %54, %53 : vector<8x32xf32>
    %56 = arith.divf %54, %55 : vector<8x32xf32>
    %57 = vector.extract_strided_slice %39 {offsets = [0, 64], sizes = [8, 32], strides = [1, 1]} : vector<8x96xf32> to vector<8x32xf32>
    %58 = vector.extract_strided_slice %40 {offsets = [0, 64], sizes = [8, 32], strides = [1, 1]} : vector<8x96xf32> to vector<8x32xf32>
    %59 = vector.broadcast %3 : vector<1x32xf32> to vector<8x32xf32>
    %60 = arith.addf %58, %59 : vector<8x32xf32>
    %61 = arith.mulf %48, %60 : vector<8x32xf32>
    %62 = arith.addf %57, %61 : vector<8x32xf32>
    %63 = math.tanh %62 : vector<8x32xf32>
    %cst_13 = arith.constant 1.000000e+00 : f32
    %64 = vector.broadcast %cst_13 : f32 to vector<8x32xf32>
    %65 = arith.subf %64, %56 : vector<8x32xf32>
    %66 = arith.mulf %65, %63 : vector<8x32xf32>
    %67 = arith.mulf %56, %38 : vector<8x32xf32>
    %68 = arith.addf %66, %67 : vector<8x32xf32>
    %69 = vector.extract_strided_slice %7 {offsets = [16, 0], sizes = [8, 96], strides = [1, 1]} : vector<80x96xf32> to vector<8x96xf32>
    %cst_14 = arith.constant dense<0.000000e+00> : vector<8x96xf32>
    %70 = tpu.matmul %68, %1, %cst_14 {dimension_numbers = #tpu.dot_dimension_numbers<[1], [0], [0], [1], [0, 0, 1, 1], [], []>} : vector<8x32xf32>, vector<32x96xf32>, vector<8x96xf32> -> vector<8x96xf32>
    %71 = vector.extract_strided_slice %69 {offsets = [0, 0], sizes = [8, 32], strides = [1, 1]} : vector<8x96xf32> to vector<8x32xf32>
    %72 = vector.extract_strided_slice %70 {offsets = [0, 0], sizes = [8, 32], strides = [1, 1]} : vector<8x96xf32> to vector<8x32xf32>
    %73 = arith.addf %71, %72 : vector<8x32xf32>
    %74 = arith.negf %73 : vector<8x32xf32>
    %75 = math.exp %74 : vector<8x32xf32>
    %cst_15 = arith.constant 1.000000e+00 : f32
    %76 = vector.broadcast %cst_15 : f32 to vector<8x32xf32>
    %77 = arith.addf %76, %75 : vector<8x32xf32>
    %78 = arith.divf %76, %77 : vector<8x32xf32>
    %79 = vector.extract_strided_slice %69 {offsets = [0, 32], sizes = [8, 32], strides = [1, 1]} : vector<8x96xf32> to vector<8x32xf32>
    %80 = vector.extract_strided_slice %70 {offsets = [0, 32], sizes = [8, 32], strides = [1, 1]} : vector<8x96xf32> to vector<8x32xf32>
    %81 = arith.addf %79, %80 : vector<8x32xf32>
    %82 = arith.negf %81 : vector<8x32xf32>
    %83 = math.exp %82 : vector<8x32xf32>
    %cst_16 = arith.constant 1.000000e+00 : f32
    %84 = vector.broadcast %cst_16 : f32 to vector<8x32xf32>
    %85 = arith.addf %84, %83 : vector<8x32xf32>
    %86 = arith.divf %84, %85 : vector<8x32xf32>
    %87 = vector.extract_strided_slice %69 {offsets = [0, 64], sizes = [8, 32], strides = [1, 1]} : vector<8x96xf32> to vector<8x32xf32>
    %88 = vector.extract_strided_slice %70 {offsets = [0, 64], sizes = [8, 32], strides = [1, 1]} : vector<8x96xf32> to vector<8x32xf32>
    %89 = vector.broadcast %3 : vector<1x32xf32> to vector<8x32xf32>
    %90 = arith.addf %88, %89 : vector<8x32xf32>
    %91 = arith.mulf %78, %90 : vector<8x32xf32>
    %92 = arith.addf %87, %91 : vector<8x32xf32>
    %93 = math.tanh %92 : vector<8x32xf32>
    %cst_17 = arith.constant 1.000000e+00 : f32
    %94 = vector.broadcast %cst_17 : f32 to vector<8x32xf32>
    %95 = arith.subf %94, %86 : vector<8x32xf32>
    %96 = arith.mulf %95, %93 : vector<8x32xf32>
    %97 = arith.mulf %86, %68 : vector<8x32xf32>
    %98 = arith.addf %96, %97 : vector<8x32xf32>
    %99 = vector.extract_strided_slice %7 {offsets = [24, 0], sizes = [8, 96], strides = [1, 1]} : vector<80x96xf32> to vector<8x96xf32>
    %cst_18 = arith.constant dense<0.000000e+00> : vector<8x96xf32>
    %100 = tpu.matmul %98, %1, %cst_18 {dimension_numbers = #tpu.dot_dimension_numbers<[1], [0], [0], [1], [0, 0, 1, 1], [], []>} : vector<8x32xf32>, vector<32x96xf32>, vector<8x96xf32> -> vector<8x96xf32>
    %101 = vector.extract_strided_slice %99 {offsets = [0, 0], sizes = [8, 32], strides = [1, 1]} : vector<8x96xf32> to vector<8x32xf32>
    %102 = vector.extract_strided_slice %100 {offsets = [0, 0], sizes = [8, 32], strides = [1, 1]} : vector<8x96xf32> to vector<8x32xf32>
    %103 = arith.addf %101, %102 : vector<8x32xf32>
    %104 = arith.negf %103 : vector<8x32xf32>
    %105 = math.exp %104 : vector<8x32xf32>
    %cst_19 = arith.constant 1.000000e+00 : f32
    %106 = vector.broadcast %cst_19 : f32 to vector<8x32xf32>
    %107 = arith.addf %106, %105 : vector<8x32xf32>
    %108 = arith.divf %106, %107 : vector<8x32xf32>
    %109 = vector.extract_strided_slice %99 {offsets = [0, 32], sizes = [8, 32], strides = [1, 1]} : vector<8x96xf32> to vector<8x32xf32>
    %110 = vector.extract_strided_slice %100 {offsets = [0, 32], sizes = [8, 32], strides = [1, 1]} : vector<8x96xf32> to vector<8x32xf32>
    %111 = arith.addf %109, %110 : vector<8x32xf32>
    %112 = arith.negf %111 : vector<8x32xf32>
    %113 = math.exp %112 : vector<8x32xf32>
    %cst_20 = arith.constant 1.000000e+00 : f32
    %114 = vector.broadcast %cst_20 : f32 to vector<8x32xf32>
    %115 = arith.addf %114, %113 : vector<8x32xf32>
    %116 = arith.divf %114, %115 : vector<8x32xf32>
    %117 = vector.extract_strided_slice %99 {offsets = [0, 64], sizes = [8, 32], strides = [1, 1]} : vector<8x96xf32> to vector<8x32xf32>
    %118 = vector.extract_strided_slice %100 {offsets = [0, 64], sizes = [8, 32], strides = [1, 1]} : vector<8x96xf32> to vector<8x32xf32>
    %119 = vector.broadcast %3 : vector<1x32xf32> to vector<8x32xf32>
    %120 = arith.addf %118, %119 : vector<8x32xf32>
    %121 = arith.mulf %108, %120 : vector<8x32xf32>
    %122 = arith.addf %117, %121 : vector<8x32xf32>
    %123 = math.tanh %122 : vector<8x32xf32>
    %cst_21 = arith.constant 1.000000e+00 : f32
    %124 = vector.broadcast %cst_21 : f32 to vector<8x32xf32>
    %125 = arith.subf %124, %116 : vector<8x32xf32>
    %126 = arith.mulf %125, %123 : vector<8x32xf32>
    %127 = arith.mulf %116, %98 : vector<8x32xf32>
    %128 = arith.addf %126, %127 : vector<8x32xf32>
    %129 = vector.extract_strided_slice %7 {offsets = [32, 0], sizes = [8, 96], strides = [1, 1]} : vector<80x96xf32> to vector<8x96xf32>
    %cst_22 = arith.constant dense<0.000000e+00> : vector<8x96xf32>
    %130 = tpu.matmul %128, %1, %cst_22 {dimension_numbers = #tpu.dot_dimension_numbers<[1], [0], [0], [1], [0, 0, 1, 1], [], []>} : vector<8x32xf32>, vector<32x96xf32>, vector<8x96xf32> -> vector<8x96xf32>
    %131 = vector.extract_strided_slice %129 {offsets = [0, 0], sizes = [8, 32], strides = [1, 1]} : vector<8x96xf32> to vector<8x32xf32>
    %132 = vector.extract_strided_slice %130 {offsets = [0, 0], sizes = [8, 32], strides = [1, 1]} : vector<8x96xf32> to vector<8x32xf32>
    %133 = arith.addf %131, %132 : vector<8x32xf32>
    %134 = arith.negf %133 : vector<8x32xf32>
    %135 = math.exp %134 : vector<8x32xf32>
    %cst_23 = arith.constant 1.000000e+00 : f32
    %136 = vector.broadcast %cst_23 : f32 to vector<8x32xf32>
    %137 = arith.addf %136, %135 : vector<8x32xf32>
    %138 = arith.divf %136, %137 : vector<8x32xf32>
    %139 = vector.extract_strided_slice %129 {offsets = [0, 32], sizes = [8, 32], strides = [1, 1]} : vector<8x96xf32> to vector<8x32xf32>
    %140 = vector.extract_strided_slice %130 {offsets = [0, 32], sizes = [8, 32], strides = [1, 1]} : vector<8x96xf32> to vector<8x32xf32>
    %141 = arith.addf %139, %140 : vector<8x32xf32>
    %142 = arith.negf %141 : vector<8x32xf32>
    %143 = math.exp %142 : vector<8x32xf32>
    %cst_24 = arith.constant 1.000000e+00 : f32
    %144 = vector.broadcast %cst_24 : f32 to vector<8x32xf32>
    %145 = arith.addf %144, %143 : vector<8x32xf32>
    %146 = arith.divf %144, %145 : vector<8x32xf32>
    %147 = vector.extract_strided_slice %129 {offsets = [0, 64], sizes = [8, 32], strides = [1, 1]} : vector<8x96xf32> to vector<8x32xf32>
    %148 = vector.extract_strided_slice %130 {offsets = [0, 64], sizes = [8, 32], strides = [1, 1]} : vector<8x96xf32> to vector<8x32xf32>
    %149 = vector.broadcast %3 : vector<1x32xf32> to vector<8x32xf32>
    %150 = arith.addf %148, %149 : vector<8x32xf32>
    %151 = arith.mulf %138, %150 : vector<8x32xf32>
    %152 = arith.addf %147, %151 : vector<8x32xf32>
    %153 = math.tanh %152 : vector<8x32xf32>
    %cst_25 = arith.constant 1.000000e+00 : f32
    %154 = vector.broadcast %cst_25 : f32 to vector<8x32xf32>
    %155 = arith.subf %154, %146 : vector<8x32xf32>
    %156 = arith.mulf %155, %153 : vector<8x32xf32>
    %157 = arith.mulf %146, %128 : vector<8x32xf32>
    %158 = arith.addf %156, %157 : vector<8x32xf32>
    %159 = vector.extract_strided_slice %7 {offsets = [40, 0], sizes = [8, 96], strides = [1, 1]} : vector<80x96xf32> to vector<8x96xf32>
    %cst_26 = arith.constant dense<0.000000e+00> : vector<8x96xf32>
    %160 = tpu.matmul %158, %1, %cst_26 {dimension_numbers = #tpu.dot_dimension_numbers<[1], [0], [0], [1], [0, 0, 1, 1], [], []>} : vector<8x32xf32>, vector<32x96xf32>, vector<8x96xf32> -> vector<8x96xf32>
    %161 = vector.extract_strided_slice %159 {offsets = [0, 0], sizes = [8, 32], strides = [1, 1]} : vector<8x96xf32> to vector<8x32xf32>
    %162 = vector.extract_strided_slice %160 {offsets = [0, 0], sizes = [8, 32], strides = [1, 1]} : vector<8x96xf32> to vector<8x32xf32>
    %163 = arith.addf %161, %162 : vector<8x32xf32>
    %164 = arith.negf %163 : vector<8x32xf32>
    %165 = math.exp %164 : vector<8x32xf32>
    %cst_27 = arith.constant 1.000000e+00 : f32
    %166 = vector.broadcast %cst_27 : f32 to vector<8x32xf32>
    %167 = arith.addf %166, %165 : vector<8x32xf32>
    %168 = arith.divf %166, %167 : vector<8x32xf32>
    %169 = vector.extract_strided_slice %159 {offsets = [0, 32], sizes = [8, 32], strides = [1, 1]} : vector<8x96xf32> to vector<8x32xf32>
    %170 = vector.extract_strided_slice %160 {offsets = [0, 32], sizes = [8, 32], strides = [1, 1]} : vector<8x96xf32> to vector<8x32xf32>
    %171 = arith.addf %169, %170 : vector<8x32xf32>
    %172 = arith.negf %171 : vector<8x32xf32>
    %173 = math.exp %172 : vector<8x32xf32>
    %cst_28 = arith.constant 1.000000e+00 : f32
    %174 = vector.broadcast %cst_28 : f32 to vector<8x32xf32>
    %175 = arith.addf %174, %173 : vector<8x32xf32>
    %176 = arith.divf %174, %175 : vector<8x32xf32>
    %177 = vector.extract_strided_slice %159 {offsets = [0, 64], sizes = [8, 32], strides = [1, 1]} : vector<8x96xf32> to vector<8x32xf32>
    %178 = vector.extract_strided_slice %160 {offsets = [0, 64], sizes = [8, 32], strides = [1, 1]} : vector<8x96xf32> to vector<8x32xf32>
    %179 = vector.broadcast %3 : vector<1x32xf32> to vector<8x32xf32>
    %180 = arith.addf %178, %179 : vector<8x32xf32>
    %181 = arith.mulf %168, %180 : vector<8x32xf32>
    %182 = arith.addf %177, %181 : vector<8x32xf32>
    %183 = math.tanh %182 : vector<8x32xf32>
    %cst_29 = arith.constant 1.000000e+00 : f32
    %184 = vector.broadcast %cst_29 : f32 to vector<8x32xf32>
    %185 = arith.subf %184, %176 : vector<8x32xf32>
    %186 = arith.mulf %185, %183 : vector<8x32xf32>
    %187 = arith.mulf %176, %158 : vector<8x32xf32>
    %188 = arith.addf %186, %187 : vector<8x32xf32>
    %189 = vector.extract_strided_slice %7 {offsets = [48, 0], sizes = [8, 96], strides = [1, 1]} : vector<80x96xf32> to vector<8x96xf32>
    %cst_30 = arith.constant dense<0.000000e+00> : vector<8x96xf32>
    %190 = tpu.matmul %188, %1, %cst_30 {dimension_numbers = #tpu.dot_dimension_numbers<[1], [0], [0], [1], [0, 0, 1, 1], [], []>} : vector<8x32xf32>, vector<32x96xf32>, vector<8x96xf32> -> vector<8x96xf32>
    %191 = vector.extract_strided_slice %189 {offsets = [0, 0], sizes = [8, 32], strides = [1, 1]} : vector<8x96xf32> to vector<8x32xf32>
    %192 = vector.extract_strided_slice %190 {offsets = [0, 0], sizes = [8, 32], strides = [1, 1]} : vector<8x96xf32> to vector<8x32xf32>
    %193 = arith.addf %191, %192 : vector<8x32xf32>
    %194 = arith.negf %193 : vector<8x32xf32>
    %195 = math.exp %194 : vector<8x32xf32>
    %cst_31 = arith.constant 1.000000e+00 : f32
    %196 = vector.broadcast %cst_31 : f32 to vector<8x32xf32>
    %197 = arith.addf %196, %195 : vector<8x32xf32>
    %198 = arith.divf %196, %197 : vector<8x32xf32>
    %199 = vector.extract_strided_slice %189 {offsets = [0, 32], sizes = [8, 32], strides = [1, 1]} : vector<8x96xf32> to vector<8x32xf32>
    %200 = vector.extract_strided_slice %190 {offsets = [0, 32], sizes = [8, 32], strides = [1, 1]} : vector<8x96xf32> to vector<8x32xf32>
    %201 = arith.addf %199, %200 : vector<8x32xf32>
    %202 = arith.negf %201 : vector<8x32xf32>
    %203 = math.exp %202 : vector<8x32xf32>
    %cst_32 = arith.constant 1.000000e+00 : f32
    %204 = vector.broadcast %cst_32 : f32 to vector<8x32xf32>
    %205 = arith.addf %204, %203 : vector<8x32xf32>
    %206 = arith.divf %204, %205 : vector<8x32xf32>
    %207 = vector.extract_strided_slice %189 {offsets = [0, 64], sizes = [8, 32], strides = [1, 1]} : vector<8x96xf32> to vector<8x32xf32>
    %208 = vector.extract_strided_slice %190 {offsets = [0, 64], sizes = [8, 32], strides = [1, 1]} : vector<8x96xf32> to vector<8x32xf32>
    %209 = vector.broadcast %3 : vector<1x32xf32> to vector<8x32xf32>
    %210 = arith.addf %208, %209 : vector<8x32xf32>
    %211 = arith.mulf %198, %210 : vector<8x32xf32>
    %212 = arith.addf %207, %211 : vector<8x32xf32>
    %213 = math.tanh %212 : vector<8x32xf32>
    %cst_33 = arith.constant 1.000000e+00 : f32
    %214 = vector.broadcast %cst_33 : f32 to vector<8x32xf32>
    %215 = arith.subf %214, %206 : vector<8x32xf32>
    %216 = arith.mulf %215, %213 : vector<8x32xf32>
    %217 = arith.mulf %206, %188 : vector<8x32xf32>
    %218 = arith.addf %216, %217 : vector<8x32xf32>
    %219 = vector.extract_strided_slice %7 {offsets = [56, 0], sizes = [8, 96], strides = [1, 1]} : vector<80x96xf32> to vector<8x96xf32>
    %cst_34 = arith.constant dense<0.000000e+00> : vector<8x96xf32>
    %220 = tpu.matmul %218, %1, %cst_34 {dimension_numbers = #tpu.dot_dimension_numbers<[1], [0], [0], [1], [0, 0, 1, 1], [], []>} : vector<8x32xf32>, vector<32x96xf32>, vector<8x96xf32> -> vector<8x96xf32>
    %221 = vector.extract_strided_slice %219 {offsets = [0, 0], sizes = [8, 32], strides = [1, 1]} : vector<8x96xf32> to vector<8x32xf32>
    %222 = vector.extract_strided_slice %220 {offsets = [0, 0], sizes = [8, 32], strides = [1, 1]} : vector<8x96xf32> to vector<8x32xf32>
    %223 = arith.addf %221, %222 : vector<8x32xf32>
    %224 = arith.negf %223 : vector<8x32xf32>
    %225 = math.exp %224 : vector<8x32xf32>
    %cst_35 = arith.constant 1.000000e+00 : f32
    %226 = vector.broadcast %cst_35 : f32 to vector<8x32xf32>
    %227 = arith.addf %226, %225 : vector<8x32xf32>
    %228 = arith.divf %226, %227 : vector<8x32xf32>
    %229 = vector.extract_strided_slice %219 {offsets = [0, 32], sizes = [8, 32], strides = [1, 1]} : vector<8x96xf32> to vector<8x32xf32>
    %230 = vector.extract_strided_slice %220 {offsets = [0, 32], sizes = [8, 32], strides = [1, 1]} : vector<8x96xf32> to vector<8x32xf32>
    %231 = arith.addf %229, %230 : vector<8x32xf32>
    %232 = arith.negf %231 : vector<8x32xf32>
    %233 = math.exp %232 : vector<8x32xf32>
    %cst_36 = arith.constant 1.000000e+00 : f32
    %234 = vector.broadcast %cst_36 : f32 to vector<8x32xf32>
    %235 = arith.addf %234, %233 : vector<8x32xf32>
    %236 = arith.divf %234, %235 : vector<8x32xf32>
    %237 = vector.extract_strided_slice %219 {offsets = [0, 64], sizes = [8, 32], strides = [1, 1]} : vector<8x96xf32> to vector<8x32xf32>
    %238 = vector.extract_strided_slice %220 {offsets = [0, 64], sizes = [8, 32], strides = [1, 1]} : vector<8x96xf32> to vector<8x32xf32>
    %239 = vector.broadcast %3 : vector<1x32xf32> to vector<8x32xf32>
    %240 = arith.addf %238, %239 : vector<8x32xf32>
    %241 = arith.mulf %228, %240 : vector<8x32xf32>
    %242 = arith.addf %237, %241 : vector<8x32xf32>
    %243 = math.tanh %242 : vector<8x32xf32>
    %cst_37 = arith.constant 1.000000e+00 : f32
    %244 = vector.broadcast %cst_37 : f32 to vector<8x32xf32>
    %245 = arith.subf %244, %236 : vector<8x32xf32>
    %246 = arith.mulf %245, %243 : vector<8x32xf32>
    %247 = arith.mulf %236, %218 : vector<8x32xf32>
    %248 = arith.addf %246, %247 : vector<8x32xf32>
    %249 = vector.extract_strided_slice %7 {offsets = [64, 0], sizes = [8, 96], strides = [1, 1]} : vector<80x96xf32> to vector<8x96xf32>
    %cst_38 = arith.constant dense<0.000000e+00> : vector<8x96xf32>
    %250 = tpu.matmul %248, %1, %cst_38 {dimension_numbers = #tpu.dot_dimension_numbers<[1], [0], [0], [1], [0, 0, 1, 1], [], []>} : vector<8x32xf32>, vector<32x96xf32>, vector<8x96xf32> -> vector<8x96xf32>
    %251 = vector.extract_strided_slice %249 {offsets = [0, 0], sizes = [8, 32], strides = [1, 1]} : vector<8x96xf32> to vector<8x32xf32>
    %252 = vector.extract_strided_slice %250 {offsets = [0, 0], sizes = [8, 32], strides = [1, 1]} : vector<8x96xf32> to vector<8x32xf32>
    %253 = arith.addf %251, %252 : vector<8x32xf32>
    %254 = arith.negf %253 : vector<8x32xf32>
    %255 = math.exp %254 : vector<8x32xf32>
    %cst_39 = arith.constant 1.000000e+00 : f32
    %256 = vector.broadcast %cst_39 : f32 to vector<8x32xf32>
    %257 = arith.addf %256, %255 : vector<8x32xf32>
    %258 = arith.divf %256, %257 : vector<8x32xf32>
    %259 = vector.extract_strided_slice %249 {offsets = [0, 32], sizes = [8, 32], strides = [1, 1]} : vector<8x96xf32> to vector<8x32xf32>
    %260 = vector.extract_strided_slice %250 {offsets = [0, 32], sizes = [8, 32], strides = [1, 1]} : vector<8x96xf32> to vector<8x32xf32>
    %261 = arith.addf %259, %260 : vector<8x32xf32>
    %262 = arith.negf %261 : vector<8x32xf32>
    %263 = math.exp %262 : vector<8x32xf32>
    %cst_40 = arith.constant 1.000000e+00 : f32
    %264 = vector.broadcast %cst_40 : f32 to vector<8x32xf32>
    %265 = arith.addf %264, %263 : vector<8x32xf32>
    %266 = arith.divf %264, %265 : vector<8x32xf32>
    %267 = vector.extract_strided_slice %249 {offsets = [0, 64], sizes = [8, 32], strides = [1, 1]} : vector<8x96xf32> to vector<8x32xf32>
    %268 = vector.extract_strided_slice %250 {offsets = [0, 64], sizes = [8, 32], strides = [1, 1]} : vector<8x96xf32> to vector<8x32xf32>
    %269 = vector.broadcast %3 : vector<1x32xf32> to vector<8x32xf32>
    %270 = arith.addf %268, %269 : vector<8x32xf32>
    %271 = arith.mulf %258, %270 : vector<8x32xf32>
    %272 = arith.addf %267, %271 : vector<8x32xf32>
    %273 = math.tanh %272 : vector<8x32xf32>
    %cst_41 = arith.constant 1.000000e+00 : f32
    %274 = vector.broadcast %cst_41 : f32 to vector<8x32xf32>
    %275 = arith.subf %274, %266 : vector<8x32xf32>
    %276 = arith.mulf %275, %273 : vector<8x32xf32>
    %277 = arith.mulf %266, %248 : vector<8x32xf32>
    %278 = arith.addf %276, %277 : vector<8x32xf32>
    %279 = vector.extract_strided_slice %7 {offsets = [72, 0], sizes = [8, 96], strides = [1, 1]} : vector<80x96xf32> to vector<8x96xf32>
    %cst_42 = arith.constant dense<0.000000e+00> : vector<8x96xf32>
    %280 = tpu.matmul %278, %1, %cst_42 {dimension_numbers = #tpu.dot_dimension_numbers<[1], [0], [0], [1], [0, 0, 1, 1], [], []>} : vector<8x32xf32>, vector<32x96xf32>, vector<8x96xf32> -> vector<8x96xf32>
    %281 = vector.extract_strided_slice %279 {offsets = [0, 0], sizes = [8, 32], strides = [1, 1]} : vector<8x96xf32> to vector<8x32xf32>
    %282 = vector.extract_strided_slice %280 {offsets = [0, 0], sizes = [8, 32], strides = [1, 1]} : vector<8x96xf32> to vector<8x32xf32>
    %283 = arith.addf %281, %282 : vector<8x32xf32>
    %284 = arith.negf %283 : vector<8x32xf32>
    %285 = math.exp %284 : vector<8x32xf32>
    %cst_43 = arith.constant 1.000000e+00 : f32
    %286 = vector.broadcast %cst_43 : f32 to vector<8x32xf32>
    %287 = arith.addf %286, %285 : vector<8x32xf32>
    %288 = arith.divf %286, %287 : vector<8x32xf32>
    %289 = vector.extract_strided_slice %279 {offsets = [0, 32], sizes = [8, 32], strides = [1, 1]} : vector<8x96xf32> to vector<8x32xf32>
    %290 = vector.extract_strided_slice %280 {offsets = [0, 32], sizes = [8, 32], strides = [1, 1]} : vector<8x96xf32> to vector<8x32xf32>
    %291 = arith.addf %289, %290 : vector<8x32xf32>
    %292 = arith.negf %291 : vector<8x32xf32>
    %293 = math.exp %292 : vector<8x32xf32>
    %cst_44 = arith.constant 1.000000e+00 : f32
    %294 = vector.broadcast %cst_44 : f32 to vector<8x32xf32>
    %295 = arith.addf %294, %293 : vector<8x32xf32>
    %296 = arith.divf %294, %295 : vector<8x32xf32>
    %297 = vector.extract_strided_slice %279 {offsets = [0, 64], sizes = [8, 32], strides = [1, 1]} : vector<8x96xf32> to vector<8x32xf32>
    %298 = vector.extract_strided_slice %280 {offsets = [0, 64], sizes = [8, 32], strides = [1, 1]} : vector<8x96xf32> to vector<8x32xf32>
    %299 = vector.broadcast %3 : vector<1x32xf32> to vector<8x32xf32>
    %300 = arith.addf %298, %299 : vector<8x32xf32>
    %301 = arith.mulf %288, %300 : vector<8x32xf32>
    %302 = arith.addf %297, %301 : vector<8x32xf32>
    %303 = math.tanh %302 : vector<8x32xf32>
    %cst_45 = arith.constant 1.000000e+00 : f32
    %304 = vector.broadcast %cst_45 : f32 to vector<8x32xf32>
    %305 = arith.subf %304, %296 : vector<8x32xf32>
    %306 = arith.mulf %305, %303 : vector<8x32xf32>
    %307 = arith.mulf %296, %278 : vector<8x32xf32>
    %308 = arith.addf %306, %307 : vector<8x32xf32>
    %c0_46 = arith.constant 0 : index
    %c0_47 = arith.constant 0 : index
    %309 = vector.load %arg5[%c0_46, %c0_47] : memref<33x16xf32, #tpu.memory_space<vmem>>, vector<32x16xf32>
    %c32 = arith.constant 32 : index
    %c0_48 = arith.constant 0 : index
    %310 = vector.load %arg5[%c32, %c0_48] : memref<33x16xf32, #tpu.memory_space<vmem>>, vector<1x16xf32>
    %cst_49 = arith.constant dense<0.000000e+00> : vector<8x16xf32>
    %311 = tpu.matmul %308, %309, %cst_49 {dimension_numbers = #tpu.dot_dimension_numbers<[1], [0], [0], [1], [0, 0, 1, 1], [], []>} : vector<8x32xf32>, vector<32x16xf32>, vector<8x16xf32> -> vector<8x16xf32>
    %312 = vector.broadcast %310 : vector<1x16xf32> to vector<8x16xf32>
    %313 = arith.addf %311, %312 : vector<8x16xf32>
    %c0_50 = arith.constant 0 : index
    %c0_51 = arith.constant 0 : index
    %314 = vector.load %arg9[%c0_50, %c0_51] : memref<8x16xf32, #tpu.memory_space<vmem>>, vector<8x16xf32>
    tpu.vector_store %arg9[%c0_50, %c0_51], %313 {strides = array<i32>} : memref<8x16xf32, #tpu.memory_space<vmem>>, vector<8x16xf32>,
    %315 = vector.extract_strided_slice %313 {offsets = [0, 0], sizes = [8, 8], strides = [1, 1]} : vector<8x16xf32> to vector<8x8xf32>
    %316 = vector.extract_strided_slice %313 {offsets = [0, 8], sizes = [8, 8], strides = [1, 1]} : vector<8x16xf32> to vector<8x8xf32>
    %c0_52 = arith.constant 0 : index
    %c0_53 = arith.constant 0 : index
    %317 = vector.load %arg3[%c0_52, %c0_53] : memref<8x8xf32, #tpu.memory_space<vmem>>, vector<8x8xf32>
    %cst_54 = arith.constant 5.000000e-01 : f32
    %318 = vector.broadcast %cst_54 : f32 to vector<8x8xf32>
    %319 = arith.mulf %318, %316 : vector<8x8xf32>
    %320 = math.exp %319 : vector<8x8xf32>
    %321 = arith.mulf %317, %320 : vector<8x8xf32>
    %322 = arith.addf %315, %321 : vector<8x8xf32>
    %c0_55 = arith.constant 0 : index
    %c0_56 = arith.constant 0 : index
    %323 = vector.load %arg6[%c0_55, %c0_56] : memref<50x96xf32, #tpu.memory_space<vmem>>, vector<8x96xf32>
    %c8_57 = arith.constant 8 : index
    %c0_58 = arith.constant 0 : index
    %324 = vector.load %arg6[%c8_57, %c0_58] : memref<50x96xf32, #tpu.memory_space<vmem>>, vector<4x96xf32>
    %c16 = arith.constant 16 : index
    %c0_59 = arith.constant 0 : index
    %325 = vector.load %arg6[%c16, %c0_59] : memref<50x96xf32, #tpu.memory_space<vmem>>, vector<32x96xf32>
    %c48 = arith.constant 48 : index
    %c0_60 = arith.constant 0 : index
    %326 = vector.load %arg6[%c48, %c0_60] : memref<50x96xf32, #tpu.memory_space<vmem>>, vector<1x96xf32>
    %c49 = arith.constant 49 : index
    %c64_61 = arith.constant 64 : index
    %327 = vector.load %arg6[%c49, %c64_61] : memref<50x96xf32, #tpu.memory_space<vmem>>, vector<1x32xf32>
    %cst_62 = arith.constant dense<0.000000e+00> : vector<8x96xf32>
    %328 = tpu.matmul %322, %323, %cst_62 {dimension_numbers = #tpu.dot_dimension_numbers<[1], [0], [0], [1], [0, 0, 1, 1], [], []>} : vector<8x8xf32>, vector<8x96xf32>, vector<8x96xf32> -> vector<8x96xf32>
    %c0_63 = arith.constant 0 : index
    %c0_64 = arith.constant 0 : index
    %329 = vector.load %arg2[%c0_63, %c0_64] : memref<8x4xf32, #tpu.memory_space<vmem>>, vector<8x4xf32>
    %cst_65 = arith.constant dense<0.000000e+00> : vector<8x96xf32>
    %330 = tpu.matmul %329, %324, %cst_65 {dimension_numbers = #tpu.dot_dimension_numbers<[1], [0], [0], [1], [0, 0, 1, 1], [], []>} : vector<8x4xf32>, vector<4x96xf32>, vector<8x96xf32> -> vector<8x96xf32>
    %331 = arith.addf %328, %330 : vector<8x96xf32>
    %332 = vector.broadcast %326 : vector<1x96xf32> to vector<8x96xf32>
    %333 = arith.addf %331, %332 : vector<8x96xf32>
    %334 = vector.extract_strided_slice %333 {offsets = [0, 0], sizes = [8, 32], strides = [1, 1]} : vector<8x96xf32> to vector<8x32xf32>
    %335 = vector.extract_strided_slice %333 {offsets = [0, 32], sizes = [8, 32], strides = [1, 1]} : vector<8x96xf32> to vector<8x32xf32>
    %336 = vector.extract_strided_slice %333 {offsets = [0, 64], sizes = [8, 32], strides = [1, 1]} : vector<8x96xf32> to vector<8x32xf32>
    %cst_66 = arith.constant 0.000000e+00 : f32
    %337 = vector.broadcast %cst_66 : f32 to vector<8x32xf32>
    %cst_67 = arith.constant dense<0.000000e+00> : vector<8x96xf32>
    %338 = tpu.matmul %337, %325, %cst_67 {dimension_numbers = #tpu.dot_dimension_numbers<[1], [0], [0], [1], [0, 0, 1, 1], [], []>} : vector<8x32xf32>, vector<32x96xf32>, vector<8x96xf32> -> vector<8x96xf32>
    %339 = vector.extract_strided_slice %338 {offsets = [0, 0], sizes = [8, 32], strides = [1, 1]} : vector<8x96xf32> to vector<8x32xf32>
    %340 = arith.addf %334, %339 : vector<8x32xf32>
    %341 = arith.negf %340 : vector<8x32xf32>
    %342 = math.exp %341 : vector<8x32xf32>
    %cst_68 = arith.constant 1.000000e+00 : f32
    %343 = vector.broadcast %cst_68 : f32 to vector<8x32xf32>
    %344 = arith.addf %343, %342 : vector<8x32xf32>
    %345 = arith.divf %343, %344 : vector<8x32xf32>
    %346 = vector.extract_strided_slice %338 {offsets = [0, 32], sizes = [8, 32], strides = [1, 1]} : vector<8x96xf32> to vector<8x32xf32>
    %347 = arith.addf %335, %346 : vector<8x32xf32>
    %348 = arith.negf %347 : vector<8x32xf32>
    %349 = math.exp %348 : vector<8x32xf32>
    %cst_69 = arith.constant 1.000000e+00 : f32
    %350 = vector.broadcast %cst_69 : f32 to vector<8x32xf32>
    %351 = arith.addf %350, %349 : vector<8x32xf32>
    %352 = arith.divf %350, %351 : vector<8x32xf32>
    %353 = vector.extract_strided_slice %338 {offsets = [0, 64], sizes = [8, 32], strides = [1, 1]} : vector<8x96xf32> to vector<8x32xf32>
    %354 = vector.broadcast %327 : vector<1x32xf32> to vector<8x32xf32>
    %355 = arith.addf %353, %354 : vector<8x32xf32>
    %356 = arith.mulf %345, %355 : vector<8x32xf32>
    %357 = arith.addf %336, %356 : vector<8x32xf32>
    %358 = math.tanh %357 : vector<8x32xf32>
    %cst_70 = arith.constant 1.000000e+00 : f32
    %359 = vector.broadcast %cst_70 : f32 to vector<8x32xf32>
    %360 = arith.subf %359, %352 : vector<8x32xf32>
    %361 = arith.mulf %360, %358 : vector<8x32xf32>
    %362 = arith.mulf %352, %337 : vector<8x32xf32>
    %363 = arith.addf %361, %362 : vector<8x32xf32>
    %c0_71 = arith.constant 0 : index
    %c0_72 = arith.constant 0 : index
    %364 = vector.load %arg10[%c0_71, %c0_72] : memref<64x32xf32, #tpu.memory_space<vmem>>, vector<8x32xf32>
    tpu.vector_store %arg10[%c0_71, %c0_72], %363 {strides = array<i32>} : memref<64x32xf32, #tpu.memory_space<vmem>>, vector<8x32xf32>,
    %cst_73 = arith.constant dense<0.000000e+00> : vector<8x96xf32>
    %365 = tpu.matmul %363, %325, %cst_73 {dimension_numbers = #tpu.dot_dimension_numbers<[1], [0], [0], [1], [0, 0, 1, 1], [], []>} : vector<8x32xf32>, vector<32x96xf32>, vector<8x96xf32> -> vector<8x96xf32>
    %366 = vector.extract_strided_slice %365 {offsets = [0, 0], sizes = [8, 32], strides = [1, 1]} : vector<8x96xf32> to vector<8x32xf32>
    %367 = arith.addf %334, %366 : vector<8x32xf32>
    %368 = arith.negf %367 : vector<8x32xf32>
    %369 = math.exp %368 : vector<8x32xf32>
    %cst_74 = arith.constant 1.000000e+00 : f32
    %370 = vector.broadcast %cst_74 : f32 to vector<8x32xf32>
    %371 = arith.addf %370, %369 : vector<8x32xf32>
    %372 = arith.divf %370, %371 : vector<8x32xf32>
    %373 = vector.extract_strided_slice %365 {offsets = [0, 32], sizes = [8, 32], strides = [1, 1]} : vector<8x96xf32> to vector<8x32xf32>
    %374 = arith.addf %335, %373 : vector<8x32xf32>
    %375 = arith.negf %374 : vector<8x32xf32>
    %376 = math.exp %375 : vector<8x32xf32>
    %cst_75 = arith.constant 1.000000e+00 : f32
    %377 = vector.broadcast %cst_75 : f32 to vector<8x32xf32>
    %378 = arith.addf %377, %376 : vector<8x32xf32>
    %379 = arith.divf %377, %378 : vector<8x32xf32>
    %380 = vector.extract_strided_slice %365 {offsets = [0, 64], sizes = [8, 32], strides = [1, 1]} : vector<8x96xf32> to vector<8x32xf32>
    %381 = vector.broadcast %327 : vector<1x32xf32> to vector<8x32xf32>
    %382 = arith.addf %380, %381 : vector<8x32xf32>
    %383 = arith.mulf %372, %382 : vector<8x32xf32>
    %384 = arith.addf %336, %383 : vector<8x32xf32>
    %385 = math.tanh %384 : vector<8x32xf32>
    %cst_76 = arith.constant 1.000000e+00 : f32
    %386 = vector.broadcast %cst_76 : f32 to vector<8x32xf32>
    %387 = arith.subf %386, %379 : vector<8x32xf32>
    %388 = arith.mulf %387, %385 : vector<8x32xf32>
    %389 = arith.mulf %379, %363 : vector<8x32xf32>
    %390 = arith.addf %388, %389 : vector<8x32xf32>
    %c8_77 = arith.constant 8 : index
    %c0_78 = arith.constant 0 : index
    %391 = vector.load %arg10[%c8_77, %c0_78] : memref<64x32xf32, #tpu.memory_space<vmem>>, vector<8x32xf32>
    tpu.vector_store %arg10[%c8_77, %c0_78], %390 {strides = array<i32>} : memref<64x32xf32, #tpu.memory_space<vmem>>, vector<8x32xf32>,
    %cst_79 = arith.constant dense<0.000000e+00> : vector<8x96xf32>
    %392 = tpu.matmul %390, %325, %cst_79 {dimension_numbers = #tpu.dot_dimension_numbers<[1], [0], [0], [1], [0, 0, 1, 1], [], []>} : vector<8x32xf32>, vector<32x96xf32>, vector<8x96xf32> -> vector<8x96xf32>
    %393 = vector.extract_strided_slice %392 {offsets = [0, 0], sizes = [8, 32], strides = [1, 1]} : vector<8x96xf32> to vector<8x32xf32>
    %394 = arith.addf %334, %393 : vector<8x32xf32>
    %395 = arith.negf %394 : vector<8x32xf32>
    %396 = math.exp %395 : vector<8x32xf32>
    %cst_80 = arith.constant 1.000000e+00 : f32
    %397 = vector.broadcast %cst_80 : f32 to vector<8x32xf32>
    %398 = arith.addf %397, %396 : vector<8x32xf32>
    %399 = arith.divf %397, %398 : vector<8x32xf32>
    %400 = vector.extract_strided_slice %392 {offsets = [0, 32], sizes = [8, 32], strides = [1, 1]} : vector<8x96xf32> to vector<8x32xf32>
    %401 = arith.addf %335, %400 : vector<8x32xf32>
    %402 = arith.negf %401 : vector<8x32xf32>
    %403 = math.exp %402 : vector<8x32xf32>
    %cst_81 = arith.constant 1.000000e+00 : f32
    %404 = vector.broadcast %cst_81 : f32 to vector<8x32xf32>
    %405 = arith.addf %404, %403 : vector<8x32xf32>
    %406 = arith.divf %404, %405 : vector<8x32xf32>
    %407 = vector.extract_strided_slice %392 {offsets = [0, 64], sizes = [8, 32], strides = [1, 1]} : vector<8x96xf32> to vector<8x32xf32>
    %408 = vector.broadcast %327 : vector<1x32xf32> to vector<8x32xf32>
    %409 = arith.addf %407, %408 : vector<8x32xf32>
    %410 = arith.mulf %399, %409 : vector<8x32xf32>
    %411 = arith.addf %336, %410 : vector<8x32xf32>
    %412 = math.tanh %411 : vector<8x32xf32>
    %cst_82 = arith.constant 1.000000e+00 : f32
    %413 = vector.broadcast %cst_82 : f32 to vector<8x32xf32>
    %414 = arith.subf %413, %406 : vector<8x32xf32>
    %415 = arith.mulf %414, %412 : vector<8x32xf32>
    %416 = arith.mulf %406, %390 : vector<8x32xf32>
    %417 = arith.addf %415, %416 : vector<8x32xf32>
    %c16_83 = arith.constant 16 : index
    %c0_84 = arith.constant 0 : index
    %418 = vector.load %arg10[%c16_83, %c0_84] : memref<64x32xf32, #tpu.memory_space<vmem>>, vector<8x32xf32>
    tpu.vector_store %arg10[%c16_83, %c0_84], %417 {strides = array<i32>} : memref<64x32xf32, #tpu.memory_space<vmem>>, vector<8x32xf32>,
    %cst_85 = arith.constant dense<0.000000e+00> : vector<8x96xf32>
    %419 = tpu.matmul %417, %325, %cst_85 {dimension_numbers = #tpu.dot_dimension_numbers<[1], [0], [0], [1], [0, 0, 1, 1], [], []>} : vector<8x32xf32>, vector<32x96xf32>, vector<8x96xf32> -> vector<8x96xf32>
    %420 = vector.extract_strided_slice %419 {offsets = [0, 0], sizes = [8, 32], strides = [1, 1]} : vector<8x96xf32> to vector<8x32xf32>
    %421 = arith.addf %334, %420 : vector<8x32xf32>
    %422 = arith.negf %421 : vector<8x32xf32>
    %423 = math.exp %422 : vector<8x32xf32>
    %cst_86 = arith.constant 1.000000e+00 : f32
    %424 = vector.broadcast %cst_86 : f32 to vector<8x32xf32>
    %425 = arith.addf %424, %423 : vector<8x32xf32>
    %426 = arith.divf %424, %425 : vector<8x32xf32>
    %427 = vector.extract_strided_slice %419 {offsets = [0, 32], sizes = [8, 32], strides = [1, 1]} : vector<8x96xf32> to vector<8x32xf32>
    %428 = arith.addf %335, %427 : vector<8x32xf32>
    %429 = arith.negf %428 : vector<8x32xf32>
    %430 = math.exp %429 : vector<8x32xf32>
    %cst_87 = arith.constant 1.000000e+00 : f32
    %431 = vector.broadcast %cst_87 : f32 to vector<8x32xf32>
    %432 = arith.addf %431, %430 : vector<8x32xf32>
    %433 = arith.divf %431, %432 : vector<8x32xf32>
    %434 = vector.extract_strided_slice %419 {offsets = [0, 64], sizes = [8, 32], strides = [1, 1]} : vector<8x96xf32> to vector<8x32xf32>
    %435 = vector.broadcast %327 : vector<1x32xf32> to vector<8x32xf32>
    %436 = arith.addf %434, %435 : vector<8x32xf32>
    %437 = arith.mulf %426, %436 : vector<8x32xf32>
    %438 = arith.addf %336, %437 : vector<8x32xf32>
    %439 = math.tanh %438 : vector<8x32xf32>
    %cst_88 = arith.constant 1.000000e+00 : f32
    %440 = vector.broadcast %cst_88 : f32 to vector<8x32xf32>
    %441 = arith.subf %440, %433 : vector<8x32xf32>
    %442 = arith.mulf %441, %439 : vector<8x32xf32>
    %443 = arith.mulf %433, %417 : vector<8x32xf32>
    %444 = arith.addf %442, %443 : vector<8x32xf32>
    %c24 = arith.constant 24 : index
    %c0_89 = arith.constant 0 : index
    %445 = vector.load %arg10[%c24, %c0_89] : memref<64x32xf32, #tpu.memory_space<vmem>>, vector<8x32xf32>
    tpu.vector_store %arg10[%c24, %c0_89], %444 {strides = array<i32>} : memref<64x32xf32, #tpu.memory_space<vmem>>, vector<8x32xf32>,
    %cst_90 = arith.constant dense<0.000000e+00> : vector<8x96xf32>
    %446 = tpu.matmul %444, %325, %cst_90 {dimension_numbers = #tpu.dot_dimension_numbers<[1], [0], [0], [1], [0, 0, 1, 1], [], []>} : vector<8x32xf32>, vector<32x96xf32>, vector<8x96xf32> -> vector<8x96xf32>
    %447 = vector.extract_strided_slice %446 {offsets = [0, 0], sizes = [8, 32], strides = [1, 1]} : vector<8x96xf32> to vector<8x32xf32>
    %448 = arith.addf %334, %447 : vector<8x32xf32>
    %449 = arith.negf %448 : vector<8x32xf32>
    %450 = math.exp %449 : vector<8x32xf32>
    %cst_91 = arith.constant 1.000000e+00 : f32
    %451 = vector.broadcast %cst_91 : f32 to vector<8x32xf32>
    %452 = arith.addf %451, %450 : vector<8x32xf32>
    %453 = arith.divf %451, %452 : vector<8x32xf32>
    %454 = vector.extract_strided_slice %446 {offsets = [0, 32], sizes = [8, 32], strides = [1, 1]} : vector<8x96xf32> to vector<8x32xf32>
    %455 = arith.addf %335, %454 : vector<8x32xf32>
    %456 = arith.negf %455 : vector<8x32xf32>
    %457 = math.exp %456 : vector<8x32xf32>
    %cst_92 = arith.constant 1.000000e+00 : f32
    %458 = vector.broadcast %cst_92 : f32 to vector<8x32xf32>
    %459 = arith.addf %458, %457 : vector<8x32xf32>
    %460 = arith.divf %458, %459 : vector<8x32xf32>
    %461 = vector.extract_strided_slice %446 {offsets = [0, 64], sizes = [8, 32], strides = [1, 1]} : vector<8x96xf32> to vector<8x32xf32>
    %462 = vector.broadcast %327 : vector<1x32xf32> to vector<8x32xf32>
    %463 = arith.addf %461, %462 : vector<8x32xf32>
    %464 = arith.mulf %453, %463 : vector<8x32xf32>
    %465 = arith.addf %336, %464 : vector<8x32xf32>
    %466 = math.tanh %465 : vector<8x32xf32>
    %cst_93 = arith.constant 1.000000e+00 : f32
    %467 = vector.broadcast %cst_93 : f32 to vector<8x32xf32>
    %468 = arith.subf %467, %460 : vector<8x32xf32>
    %469 = arith.mulf %468, %466 : vector<8x32xf32>
    %470 = arith.mulf %460, %444 : vector<8x32xf32>
    %471 = arith.addf %469, %470 : vector<8x32xf32>
    %c32_94 = arith.constant 32 : index
    %c0_95 = arith.constant 0 : index
    %472 = vector.load %arg10[%c32_94, %c0_95] : memref<64x32xf32, #tpu.memory_space<vmem>>, vector<8x32xf32>
    tpu.vector_store %arg10[%c32_94, %c0_95], %471 {strides = array<i32>} : memref<64x32xf32, #tpu.memory_space<vmem>>, vector<8x32xf32>,
    %cst_96 = arith.constant dense<0.000000e+00> : vector<8x96xf32>
    %473 = tpu.matmul %471, %325, %cst_96 {dimension_numbers = #tpu.dot_dimension_numbers<[1], [0], [0], [1], [0, 0, 1, 1], [], []>} : vector<8x32xf32>, vector<32x96xf32>, vector<8x96xf32> -> vector<8x96xf32>
    %474 = vector.extract_strided_slice %473 {offsets = [0, 0], sizes = [8, 32], strides = [1, 1]} : vector<8x96xf32> to vector<8x32xf32>
    %475 = arith.addf %334, %474 : vector<8x32xf32>
    %476 = arith.negf %475 : vector<8x32xf32>
    %477 = math.exp %476 : vector<8x32xf32>
    %cst_97 = arith.constant 1.000000e+00 : f32
    %478 = vector.broadcast %cst_97 : f32 to vector<8x32xf32>
    %479 = arith.addf %478, %477 : vector<8x32xf32>
    %480 = arith.divf %478, %479 : vector<8x32xf32>
    %481 = vector.extract_strided_slice %473 {offsets = [0, 32], sizes = [8, 32], strides = [1, 1]} : vector<8x96xf32> to vector<8x32xf32>
    %482 = arith.addf %335, %481 : vector<8x32xf32>
    %483 = arith.negf %482 : vector<8x32xf32>
    %484 = math.exp %483 : vector<8x32xf32>
    %cst_98 = arith.constant 1.000000e+00 : f32
    %485 = vector.broadcast %cst_98 : f32 to vector<8x32xf32>
    %486 = arith.addf %485, %484 : vector<8x32xf32>
    %487 = arith.divf %485, %486 : vector<8x32xf32>
    %488 = vector.extract_strided_slice %473 {offsets = [0, 64], sizes = [8, 32], strides = [1, 1]} : vector<8x96xf32> to vector<8x32xf32>
    %489 = vector.broadcast %327 : vector<1x32xf32> to vector<8x32xf32>
    %490 = arith.addf %488, %489 : vector<8x32xf32>
    %491 = arith.mulf %480, %490 : vector<8x32xf32>
    %492 = arith.addf %336, %491 : vector<8x32xf32>
    %493 = math.tanh %492 : vector<8x32xf32>
    %cst_99 = arith.constant 1.000000e+00 : f32
    %494 = vector.broadcast %cst_99 : f32 to vector<8x32xf32>
    %495 = arith.subf %494, %487 : vector<8x32xf32>
    %496 = arith.mulf %495, %493 : vector<8x32xf32>
    %497 = arith.mulf %487, %471 : vector<8x32xf32>
    %498 = arith.addf %496, %497 : vector<8x32xf32>
    %c40_100 = arith.constant 40 : index
    %c0_101 = arith.constant 0 : index
    %499 = vector.load %arg10[%c40_100, %c0_101] : memref<64x32xf32, #tpu.memory_space<vmem>>, vector<8x32xf32>
    tpu.vector_store %arg10[%c40_100, %c0_101], %498 {strides = array<i32>} : memref<64x32xf32, #tpu.memory_space<vmem>>, vector<8x32xf32>,
    %cst_102 = arith.constant dense<0.000000e+00> : vector<8x96xf32>
    %500 = tpu.matmul %498, %325, %cst_102 {dimension_numbers = #tpu.dot_dimension_numbers<[1], [0], [0], [1], [0, 0, 1, 1], [], []>} : vector<8x32xf32>, vector<32x96xf32>, vector<8x96xf32> -> vector<8x96xf32>
    %501 = vector.extract_strided_slice %500 {offsets = [0, 0], sizes = [8, 32], strides = [1, 1]} : vector<8x96xf32> to vector<8x32xf32>
    %502 = arith.addf %334, %501 : vector<8x32xf32>
    %503 = arith.negf %502 : vector<8x32xf32>
    %504 = math.exp %503 : vector<8x32xf32>
    %cst_103 = arith.constant 1.000000e+00 : f32
    %505 = vector.broadcast %cst_103 : f32 to vector<8x32xf32>
    %506 = arith.addf %505, %504 : vector<8x32xf32>
    %507 = arith.divf %505, %506 : vector<8x32xf32>
    %508 = vector.extract_strided_slice %500 {offsets = [0, 32], sizes = [8, 32], strides = [1, 1]} : vector<8x96xf32> to vector<8x32xf32>
    %509 = arith.addf %335, %508 : vector<8x32xf32>
    %510 = arith.negf %509 : vector<8x32xf32>
    %511 = math.exp %510 : vector<8x32xf32>
    %cst_104 = arith.constant 1.000000e+00 : f32
    %512 = vector.broadcast %cst_104 : f32 to vector<8x32xf32>
    %513 = arith.addf %512, %511 : vector<8x32xf32>
    %514 = arith.divf %512, %513 : vector<8x32xf32>
    %515 = vector.extract_strided_slice %500 {offsets = [0, 64], sizes = [8, 32], strides = [1, 1]} : vector<8x96xf32> to vector<8x32xf32>
    %516 = vector.broadcast %327 : vector<1x32xf32> to vector<8x32xf32>
    %517 = arith.addf %515, %516 : vector<8x32xf32>
    %518 = arith.mulf %507, %517 : vector<8x32xf32>
    %519 = arith.addf %336, %518 : vector<8x32xf32>
    %520 = math.tanh %519 : vector<8x32xf32>
    %cst_105 = arith.constant 1.000000e+00 : f32
    %521 = vector.broadcast %cst_105 : f32 to vector<8x32xf32>
    %522 = arith.subf %521, %514 : vector<8x32xf32>
    %523 = arith.mulf %522, %520 : vector<8x32xf32>
    %524 = arith.mulf %514, %498 : vector<8x32xf32>
    %525 = arith.addf %523, %524 : vector<8x32xf32>
    %c48_106 = arith.constant 48 : index
    %c0_107 = arith.constant 0 : index
    %526 = vector.load %arg10[%c48_106, %c0_107] : memref<64x32xf32, #tpu.memory_space<vmem>>, vector<8x32xf32>
    tpu.vector_store %arg10[%c48_106, %c0_107], %525 {strides = array<i32>} : memref<64x32xf32, #tpu.memory_space<vmem>>, vector<8x32xf32>,
    %cst_108 = arith.constant dense<0.000000e+00> : vector<8x96xf32>
    %527 = tpu.matmul %525, %325, %cst_108 {dimension_numbers = #tpu.dot_dimension_numbers<[1], [0], [0], [1], [0, 0, 1, 1], [], []>} : vector<8x32xf32>, vector<32x96xf32>, vector<8x96xf32> -> vector<8x96xf32>
    %528 = vector.extract_strided_slice %527 {offsets = [0, 0], sizes = [8, 32], strides = [1, 1]} : vector<8x96xf32> to vector<8x32xf32>
    %529 = arith.addf %334, %528 : vector<8x32xf32>
    %530 = arith.negf %529 : vector<8x32xf32>
    %531 = math.exp %530 : vector<8x32xf32>
    %cst_109 = arith.constant 1.000000e+00 : f32
    %532 = vector.broadcast %cst_109 : f32 to vector<8x32xf32>
    %533 = arith.addf %532, %531 : vector<8x32xf32>
    %534 = arith.divf %532, %533 : vector<8x32xf32>
    %535 = vector.extract_strided_slice %527 {offsets = [0, 32], sizes = [8, 32], strides = [1, 1]} : vector<8x96xf32> to vector<8x32xf32>
    %536 = arith.addf %335, %535 : vector<8x32xf32>
    %537 = arith.negf %536 : vector<8x32xf32>
    %538 = math.exp %537 : vector<8x32xf32>
    %cst_110 = arith.constant 1.000000e+00 : f32
    %539 = vector.broadcast %cst_110 : f32 to vector<8x32xf32>
    %540 = arith.addf %539, %538 : vector<8x32xf32>
    %541 = arith.divf %539, %540 : vector<8x32xf32>
    %542 = vector.extract_strided_slice %527 {offsets = [0, 64], sizes = [8, 32], strides = [1, 1]} : vector<8x96xf32> to vector<8x32xf32>
    %543 = vector.broadcast %327 : vector<1x32xf32> to vector<8x32xf32>
    %544 = arith.addf %542, %543 : vector<8x32xf32>
    %545 = arith.mulf %534, %544 : vector<8x32xf32>
    %546 = arith.addf %336, %545 : vector<8x32xf32>
    %547 = math.tanh %546 : vector<8x32xf32>
    %cst_111 = arith.constant 1.000000e+00 : f32
    %548 = vector.broadcast %cst_111 : f32 to vector<8x32xf32>
    %549 = arith.subf %548, %541 : vector<8x32xf32>
    %550 = arith.mulf %549, %547 : vector<8x32xf32>
    %551 = arith.mulf %541, %525 : vector<8x32xf32>
    %552 = arith.addf %550, %551 : vector<8x32xf32>
    %c56 = arith.constant 56 : index
    %c0_112 = arith.constant 0 : index
    %553 = vector.load %arg10[%c56, %c0_112] : memref<64x32xf32, #tpu.memory_space<vmem>>, vector<8x32xf32>
    tpu.vector_store %arg10[%c56, %c0_112], %552 {strides = array<i32>} : memref<64x32xf32, #tpu.memory_space<vmem>>, vector<8x32xf32>,
    %c0_113 = arith.constant 0 : index
    %c0_114 = arith.constant 0 : index
    %554 = vector.load %arg7[%c0_113, %c0_114] : memref<33x6xf32, #tpu.memory_space<vmem>>, vector<32x6xf32>
    %c32_115 = arith.constant 32 : index
    %c0_116 = arith.constant 0 : index
    %555 = vector.load %arg7[%c32_115, %c0_116] : memref<33x6xf32, #tpu.memory_space<vmem>>, vector<1x6xf32>
    %c0_117 = arith.constant 0 : index
    %c0_118 = arith.constant 0 : index
    %556 = vector.load %arg10[%c0_117, %c0_118] : memref<64x32xf32, #tpu.memory_space<vmem>>, vector<64x32xf32>
    %cst_119 = arith.constant dense<0.000000e+00> : vector<64x6xf32>
    %557 = tpu.matmul %556, %554, %cst_119 {dimension_numbers = #tpu.dot_dimension_numbers<[1], [0], [0], [1], [0, 0, 1, 1], [], []>} : vector<64x32xf32>, vector<32x6xf32>, vector<64x6xf32> -> vector<64x6xf32>
    %558 = vector.broadcast %555 : vector<1x6xf32> to vector<64x6xf32>
    %559 = arith.addf %557, %558 : vector<64x6xf32>
    %c0_120 = arith.constant 0 : index
    %c0_121 = arith.constant 0 : index
    %560 = vector.load %arg8[%c0_120, %c0_121] : memref<64x6xf32, #tpu.memory_space<vmem>>, vector<64x6xf32>
    tpu.vector_store %arg8[%c0_120, %c0_121], %559 {strides = array<i32>} : memref<64x6xf32, #tpu.memory_space<vmem>>, vector<64x6xf32>,
    return
  }
  func.func @transform_0(%arg0: i32) -> (i32, i32) {
    %c0_i32 = arith.constant 0 : i32
    %c0_i32_0 = arith.constant 0 : i32
    return %arg0, %c0_i32 : i32, i32
  }
  func.func @transform_1(%arg0: i32) -> (i32, i32) {
    %c0_i32 = arith.constant 0 : i32
    %c0_i32_0 = arith.constant 0 : i32
    return %arg0, %c0_i32 : i32, i32
  }
  func.func @transform_2(%arg0: i32) -> (i32, i32) {
    %c0_i32 = arith.constant 0 : i32
    %c0_i32_0 = arith.constant 0 : i32
    return %arg0, %c0_i32 : i32, i32
  }
  func.func @transform_3(%arg0: i32) -> (i32, i32) {
    %c0_i32 = arith.constant 0 : i32
    %c0_i32_0 = arith.constant 0 : i32
    %c0_i32_1 = arith.constant 0 : i32
    return %c0_i32, %c0_i32_0 : i32, i32
  }
  func.func @transform_4(%arg0: i32) -> (i32, i32) {
    %c0_i32 = arith.constant 0 : i32
    %c0_i32_0 = arith.constant 0 : i32
    %c0_i32_1 = arith.constant 0 : i32
    return %c0_i32, %c0_i32_0 : i32, i32
  }
  func.func @transform_5(%arg0: i32) -> (i32, i32) {
    %c0_i32 = arith.constant 0 : i32
    %c0_i32_0 = arith.constant 0 : i32
    %c0_i32_1 = arith.constant 0 : i32
    return %c0_i32, %c0_i32_0 : i32, i32
  }
  func.func @transform_6(%arg0: i32) -> (i32, i32) {
    %c0_i32 = arith.constant 0 : i32
    %c0_i32_0 = arith.constant 0 : i32
    %c0_i32_1 = arith.constant 0 : i32
    return %c0_i32, %c0_i32_0 : i32, i32
  }
  func.func @transform_7(%arg0: i32) -> (i32, i32) {
    %c0_i32 = arith.constant 0 : i32
    %c0_i32_0 = arith.constant 0 : i32
    return %arg0, %c0_i32 : i32, i32
  }
  func.func @transform_8(%arg0: i32) -> (i32, i32) {
    %c0_i32 = arith.constant 0 : i32
    %c0_i32_0 = arith.constant 0 : i32
    return %arg0, %c0_i32 : i32, i32
  }
}

</mosaic_0001>

<bundles_post_ra>
// kernel: tpu_custom_call.1
= control target key start
LH: loop header
LB: loop body
LE: loop exit
PB: predicated region body
PF: predicated region fallthrough
CT: control target
= control target key end

     0   :  { %s4334_s0 = inlined_call_operand.vmem [shape: f32[160,6], index: 0, kind: input, shape index: {}]   ;;  %s4335_s1 = inlined_call_operand.vmem [shape: f32[16,4], index: 1, kind: input, shape index: {}]   ;;  %s4336_s2 = inlined_call_operand.vmem [shape: f32[16,8], index: 2, kind: input, shape index: {}]   ;;  %s4337_s3 = inlined_call_operand.vmem [shape: f32[42,96], index: 3, kind: input, shape index: {}]   ;;  %s4338_s4 = inlined_call_operand.vmem [shape: f32[33,16], index: 4, kind: input, shape index: {}]   ;;  %s4339_s5 = inlined_call_operand.vmem [shape: f32[50,96], index: 5, kind: input, shape index: {}]   ;;  %s4340_s6 = inlined_call_operand.vmem [shape: f32[33,6], index: 6, kind: input, shape index: {}]   ;;  %s4341_s7 = inlined_call_operand.vmem [shape: f32[128,6], index: 7, kind: output, shape index: {0}]   ;;  %s4342_s8 = inlined_call_operand.hbm [shape: f32[16,16], index: 8, kind: output, shape index: {1}]  }
   0x1   :  { %4343 = sst [smem:[#allocation6_spill]] %s4334_s0 }
   0x2   :  { %14 = vsyncpa [#allocation4], 0 }
   0x3   :  { %16 = vsyncpa [#allocation4 + $0x1], 0  ;;  %s3779_s27 = smov 0   ;;  %s3781_s28 = smov 0  }
   0x4   :  { %s3783_s29 = smov 0   ;;  %s3785_s30 = smov 0  }
   0x5 LB: > { %s3800_s9 = sadd.s32 4294967295, %s3725_s30   ;;  %s2929_s10 = sadd.s32 4294967294, %s3725_s30   ;;  %s3725_s30 = sphi %s3785_s30, %s4350_s30   ;;  %s3721_s29 = sphi %s3783_s29, %s4349_s29   ;;  %s3717_s28 = sphi %s3781_s28, %s4348_s28   ;;  %s3713_s27 = sphi %s3779_s27, %s4347_s27  }
   0x6   : > { %s3804_s11 = sadd.s32 1, %s3725_s30   ;;  %s217_s12 = sadd.s32 1, %s3721_s29 }
   0x7   : > { %s214_s13 = ssub.s32 %s3725_s30, %s3804_s11  ;;  %p227_p0 = scmp.ne.s32.totalorder %s3721_s29, %s3717_s28 }
   0x8   : > { %p215_p1 = scmp.eq.s32.totalorder %s214_s13, 0  ;;  %p228_p2 = scmp.eq.s32.totalorder %s3800_s9, 1 }
   0x9   : > { %p233_p3 = scmp.ne.s32.totalorder %s3717_s28, %s3713_s27  ;;  %p234_p4 = scmp.eq.s32.totalorder %s2929_s10, 1 }
   0xa   : > { %s3815_s14 = scalar_select %p215_p1, %s3721_s29, %s217_s12  }
   0xb   : > { %p3817_p5 = por %p228_p2, %p227_p0  ;;  %p3821_p6 = por %p234_p4, %p233_p3 }
   0xc   : > { %p2932_p7 = scmp.ge.s32.totalorder %s3725_s30, 1  ;;  %p287_p8 = scmp.lt.s32.totalorder %s3725_s30, 3 }
   0xe   : > { %p288_p9 = pnand %p2932_p7, %p287_p8 }
   0xf   : > { %v354_v0 = vld [vmem:[%s4337_s3] sm:$0x3f] (!%p288_p9)  ;;  %vm406_vm0 = vcmask (!%p288_p9), 1045504   ;;  %s334_s19 = smul.u32 (!%p288_p9), 10, %s3800_s9  ;;  %v3727_v1 = vmov (!%p288_p9), 0.0|0.0   ;;  %v355_v2 = vld [vmem:[%s4337_s3 + $0x8] sm:$0xff] (!%p288_p9) }
  0x10   : > { %291 = sbr.rel (%p288_p9) target bundleno = 13001 (0x32c9), region = 48  ;;  %3506 = vmatprep.subr.msk.mxu1 (!%p288_p9), %vm406_vm0, %v354_v0  ;;  %3128 = vmatprep.subr.msk.mxu0 (!%p288_p9), %vm406_vm0, %v354_v0  ;;  %v356_v3 = vld [vmem:[%s4337_s3 + $0x10] sm:$0xff] (!%p288_p9)  ;;  %vm375_vm1 = vcmask (!%p288_p9), 48128   ;;  %s4346_s0 = sld [smem:[#allocation6_spill]] (!%p288_p9)  ;;  %v357_v5 = vld [vmem:[%s4337_s3 + $0x18] sm:$0xff] (!%p288_p9)  ;;  %v358_v6 = vld [vmem:[%s4337_s3 + $0x20] sm:$0xff] (!%p288_p9) }
  0x11   : > { %3507 = vmatpush3.msk.msra.mxu1 (!%p288_p9), %vm406_vm0, %v354_v0  ;;  %p335_p10 = scmp.lt.s32.totalorder (!%p288_p9), %s334_s19, 19  ;;  %3129 = vmatpush3.msk.msra.mxu0 (!%p288_p9), %vm406_vm0, %v354_v0  ;;  %v3844_v4 = vpack.c.bf16 (!%p288_p9), %v356_v3, %v355_v2  ;;  %v3863_v13 = vpack.c.bf16 (!%p288_p9), %v358_v6, %v357_v5  ;;  %vm3728_vm2 = vmmov (!%p288_p9), 0   ;;  %v3729_v16 = vmov (!%p288_p9), 0.0   ;;  %v3902_v25 = vld [vmem:[%s4337_s3 + $0x29] ss:$0 sm:$0xff] (!%p288_p9)  ;;  %s3730_s21 = smov (!%p288_p9), 64  }
  0x12   : > { %3384 = vmatprep.subr.bf16.mxu1 (!%p288_p9), %v3727_v1  ;;  %3396 = vmatprep.subr.bf16.mxu0 (!%p288_p9), %v3727_v1  ;;  %v3909_v29 = vld [vmem:[%s4337_s3 + $0x28] ss:$0 sm:$0xff] (!%p288_p9)  ;;  %vm525_vm3 = vcmask (!%p288_p9), 261120   ;;  %vm1657_vm4 = vcmask (!%p288_p9), 1043456   ;;  %p340_p11 = scmp.lt.s32.totalorder (!%p288_p9), %s3800_s9, 1  ;;  %vm1653_vm5 = vcmask (!%p288_p9), 31744  }
  0x13   : > { %s331_s26 = sand.u32 (!%p288_p9), 1, %s3717_s28   ;;  %vm1632_vm6 = vcmask (!%p288_p9), 130048   ;;  %s3732_s23 = smov (!%p288_p9), 120   ;;  %vm1731_vm7 = vcmask (!%p288_p9), 64512  }
  0x14   : > { %s2804_s13 = scalar_lea.sflag (!%p288_p9), [#allocation4], %s331_s26 }
  0x17   : > { %s4352_s19 = smov (!%p335_p10, %s334_s19), 19 }
  0x18   : > { %s2934_s24 = sshll.u32 %s4352_s19, 3 }
  0x19   : > { %s3842_s10 = scalar_lea.vmem %s4346_s0, %s2934_s24  ;;  %s3731_s24 = smov 96  }
  0x1a   : > { %v365_v7 = vld [vmem:[%s3842_s10 + $0x20] sm:$0xff]  ;;  %v366_v8 = vld [vmem:[%s3842_s10 + $0x28] sm:$0xff]  ;;  %v367_v9 = vld [vmem:[%s3842_s10 + $0x30] sm:$0xff]  ;;  %s4072_s19 = scalar_select %p340_p11, %s3800_s9, 1 }
  0x1b   : > { %3136 = vmatprep.mubr.msk.f32.mxu1 %vm375_vm1, %v365_v7  ;;  %v361_v10 = vld [vmem:[%s3842_s10] sm:$0xff]  ;;  %v362_v11 = vld [vmem:[%s3842_s10 + $0x8] sm:$0xff]  ;;  %v368_v12 = vld [vmem:[%s3842_s10 + $0x38] sm:$0xff] }
  0x1c   : > { %3137 = vmatmul.mubr.msk.f32.vlgmr.msra.gmra.mrb[0].mxu1 %vm375_vm1, %v366_v8  ;;  %3130 = vmatprep.mubr.msk.f32.mxu0 %vm375_vm1, %v361_v10  ;;  %v369_v14 = vld [vmem:[%s3842_s10 + $0x40] sm:$0xff]  ;;  %v370_v15 = vld [vmem:[%s3842_s10 + $0x48] sm:$0xff]  ;;  %v363_v60 = vld [vmem:[%s3842_s10 + $0x10] sm:$0xff]  ;;  %s2935_s20 = sshll.u32 %s4072_s19, 3 }
  0x1d   : > { %3386 = vmatpush3.bf16.msra.mxu1 %v3844_v4  ;;  %3139 = vmatprep.mubr.msk.f32.mxu1 %vm375_vm1, %v367_v9  ;;  %v364_v61 = vld [vmem:[%s3842_s10 + $0x18] sm:$0xff]  ;;  %s343_s25 = scalar_lea.vmem %s4335_s1, %s2935_s20  ;;  %s4099_s10 = sshll.u32 %s331_s26, 3 }
  0x1e   : > { %3387 = vmatprep.subr.bf16.mxu1 %v3727_v1  ;;  %3131 = vmatmul.mubr.msk.f32.vlgmr.msra.gmra.mrb[0].mxu0 %vm375_vm1, %v362_v11  ;;  %s333_s17 = scalar_lea.vmem [#allocation3], %s4099_s10  ;;  %s347_s22 = scalar_lea.vmem %s4336_s2, %s2935_s20 }
  0x1f   : > { %3398 = vmatpush3.bf16.msra.mxu0 %v3844_v4  ;;  %3133 = vmatprep.mubr.msk.f32.mxu0 %vm375_vm1, %v363_v60  ;;  %s2937_s20 = sshll.u32 %s3800_s9, 3 }
  0x20   : > { %3140 = vmatmul.mubr.msk.f32.gmra.mrb[2].mxu1 %vm375_vm1, %v368_v12  ;;  %3399 = vmatprep.subr.bf16.mxu0 %v3727_v1  ;;  %p349_p12 = scmp.lt.s32.totalorder %s2937_s20, 15 }
  0x21   : > { %3389 = vmatpush3.bf16.msra.mxu1 %v3863_v13  ;;  %3142 = vmatprep.mubr.msk.f32.mxu1 %vm375_vm1, %v369_v14 }
  0x22   : > { %3390 = vmatprep.subr.bf16.mxu1 %v3727_v1  ;;  %3134 = vmatmul.mubr.msk.f32.gmra.mrb[2].mxu0 %vm375_vm1, %v364_v61  ;;  %s4354_s20 = smov (!%p349_p12, %s2937_s20), 15 }
  0x23   : > { %3401 = vmatpush3.bf16.msra.mxu0 %v3863_v13  ;;  %3175 = vmatprep.mubr.msk.f32.mxu0 %vm3728_vm2, %v3729_v16 }
  0x24   : > { %3143 = vmatmul.mubr.msk.f32.gmra.mrb[4].mxu1 %vm375_vm1, %v370_v15  ;;  %3408 = vmatprep.subr.bf16.mxu0 %v3727_v1 }
  0x25   : > { %3153 = vmatprep.mubr.msk.f32.mxu1 %vm3728_vm2, %v3729_v16 }
  0x28   : > { %3154 = vmatmul.mubr.f32.vlgmr.msra.gmra.mrb[6].mxu1 %v3729_v16 }
  0x29   : > { %3392 = vmatpush3.bf16.msra.mxu1 %v3844_v4  ;;  %3164 = vmatprep.mubr.msk.f32.mxu1 %vm3728_vm2, %v3729_v16 }
  0x2a   : > { %3393 = vmatprep.subr.bf16.mxu1 %v3727_v1 }
  0x2d   : > { %3395 = vmatpush3.bf16.msra.mxu1 %v3863_v13 }
  0x2e   : > { %3402 = vmatprep.subr.bf16.mxu1 %v3727_v1 }
  0xef   : > { %v3887_v17 = vpop.f32.mrb[0].mxu1 }
  0xf0   : > { %v3889_v18 = vpop.f32.mrb[1].mxu1 }
  0xf1   : > { %v3132_v19 = vpop.f32.mrb[0].mxu0 }
  0xf2   : > { %v476_v20 = vpop.f32.mrb[1].mxu0  ;;  %v482_v50 = vadd.f32 %v3132_v19, %v3909_v29 }
  0xf3   : > { %v3891_v21 = vpop.f32.mrb[2].mxu1  ;;  %v477_v30 = vadd.f32 %v3909_v29, %v476_v20 }
  0xf4   : > { %v3893_v22 = vpop.f32.mrb[3].mxu1 }
  0xf5   : > { %v3135_v6 = vpop.f32.mrb[2].mxu0 }
  0xf6   : > { %v486_v7 = vpop.f32.mrb[3].mxu0 }
  0xf7   : > { %v3895_v23 = vpop.f32.mrb[4].mxu1  ;;  %v487_v12 = vadd.f32 %v3909_v29, %v486_v7 }
  0xf8   : > { %v3897_v24 = vpop.f32.mrb[5].mxu1 }
  0xfb   : > { %v595_v26 = vpop.f32.mrb[6].mxu1 }
  0xfc   : > { %v3155_v27 = vpop.f32.mrb[7].mxu1  ;;  %v610_v28 = vadd.f32 %v3902_v25, %v595_v26  ;;  %v599_v31 = vadd.f32 %v595_v26, %v477_v30 }
  0xfe   : > { %612 = vrot.lane.b32.xlu0 %v610_v28, %s3730_s21  ;;  %v2951_v32 = vmul.f32 -1.442695, %v599_v31 }
 0x100   : > { %3553 = vpow2.f32 %v2951_v32 }
 0x10a   : > { %v3554_v33 = vpop.eup %3553 }
 0x10b   : > { %v603_v34 = vadd.f32 1.0, %v3554_v33 }
 0x10d   : > { %3555 = vrcp.f32 %v603_v34 }
 0x117   : > { %v3556_v35 = vpop.eup %3555 }
 0x118   : > { %v622_v41 = vsub.f32 1.0, %v3556_v35  ;;  %v628_v43 = vmul.f32 0.0, %v3556_v35 }
 0x170   : > { %v613_v36 = vpop.permute.xlu0 %612 }
 0x171   : > { %v615_v37 = vmul.f32 %v3556_v35, %v613_v36 }
 0x173   : > { %617 = vrot.lane.b32.xlu0 %v615_v37, %s3730_s21 }
 0x1e5   : > { %v618_v38 = vpop.permute.xlu0 %617 }
 0x1e6   : > { %v620_v39 = vadd.f32 %v618_v38, %v477_v30 }
 0x1e8   : > { %3557 = vtanh.f32 %v620_v39 }
 0x1f2   : > { %v3558_v40 = vpop.eup %3557 }
 0x1f3   : > { %624 = vrot.lane.b32.xlu1 %v3558_v40, %s3731_s24 }
 0x265   : > { %v625_v42 = vpop.permute.xlu1 %624 }
 0x266   : > { %v627_v44 = vmul.f32 %v625_v42, %v622_v41  ;;  %v492_v42 = vadd.f32 %v3135_v6, %v3909_v29 }
 0x268   : > { %v629_v45 = vadd.f32 %v628_v43, %v627_v44 }
 0x26a   : > { %631 = vrot.lane.b32.xlu1 %v629_v45, %s3731_s24 }
 0x2dc   : > { %v632_v46 = vpop.permute.xlu1 %631 }
 0x2dd   : > { %3165 = vmatmul.mubr.msk.f32.vlgmr.msra.gmra.mrb[8].mxu1 %vm525_vm3, %v632_v46 }
 0x2de   : > { %3404 = vmatpush3.bf16.msra.mxu1 %v3844_v4  ;;  %3186 = vmatprep.mubr.msk.f32.mxu1 %vm3728_vm2, %v3729_v16 }
 0x2df   : > { %3405 = vmatprep.subr.bf16.mxu1 %v3727_v1 }
 0x2e2   : > { %3407 = vmatpush3.bf16.msra.mxu1 %v3863_v13 }
 0x2e3   : > { %3414 = vmatprep.subr.bf16.mxu1 %v3727_v1 }
 0x3b0   : > { %v701_v47 = vpop.f32.mrb[8].mxu1 }
 0x3b1   : > { %v712_v48 = vadd.f32 %v3902_v25, %v701_v47  ;;  %v3166_v49 = vpop.f32.mrb[9].mxu1  ;;  %v705_v51 = vadd.f32 %v701_v47, %v482_v50 }
 0x3b3   : > { %714 = vrot.lane.b32.xlu0 %v712_v48, %s3730_s21  ;;  %v2954_v52 = vmul.f32 -1.442695, %v705_v51 }
 0x3b5   : > { %3559 = vpow2.f32 %v2954_v52 }
 0x3bf   : > { %v3560_v53 = vpop.eup %3559 }
 0x3c0   : > { %v709_v54 = vadd.f32 1.0, %v3560_v53 }
 0x3c2   : > { %3561 = vrcp.f32 %v709_v54 }
 0x3cc   : > { %v3562_v55 = vpop.eup %3561 }
 0x3cd   : > { %v724_v63 = vsub.f32 1.0, %v3562_v55  ;;  %v730_v2 = vmul.f32 %v3562_v55, %v629_v45 }
 0x425   : > { %v715_v56 = vpop.permute.xlu0 %714 }
 0x426   : > { %v717_v57 = vmul.f32 %v3562_v55, %v715_v56 }
 0x428   : > { %719 = vrot.lane.b32.xlu1 %v717_v57, %s3730_s21 }
 0x49a   : > { %v720_v58 = vpop.permute.xlu1 %719 }
 0x49b   : > { %v722_v59 = vadd.f32 %v720_v58, %v482_v50 }
 0x49d   : > { %3563 = vtanh.f32 %v722_v59 }
 0x4a7   : > { %v3564_v62 = vpop.eup %3563 }
 0x4a8   : > { %726 = vrot.lane.b32.xlu0 %v3564_v62, %s3731_s24  ;;  %v497_v62 = vadd.f32 %v3909_v29, %v3889_v18 }
 0x51a   : > { %v727_v0 = vpop.permute.xlu0 %726 }
 0x51b   : > { %v729_v3 = vmul.f32 %v727_v0, %v724_v63 }
 0x51d   : > { %v731_v5 = vadd.f32 %v730_v2, %v729_v3 }
 0x51f   : > { %733 = vrot.lane.b32.xlu1 %v731_v5, %s3731_s24 }
 0x591   : > { %v734_v8 = vpop.permute.xlu1 %733 }
 0x592   : > { %3176 = vmatmul.mubr.msk.f32.vlgmr.msra.gmra.mrb[4].mxu0 %vm525_vm3, %v734_v8 }
 0x593   : > { %3410 = vmatpush3.bf16.msra.mxu0 %v3844_v4  ;;  %3197 = vmatprep.mubr.msk.f32.mxu0 %vm3728_vm2, %v3729_v16 }
 0x594   : > { %3411 = vmatprep.subr.bf16.mxu0 %v3727_v1 }
 0x597   : > { %3413 = vmatpush3.bf16.msra.mxu0 %v3863_v13 }
 0x598   : > { %3420 = vmatprep.subr.bf16.mxu0 %v3727_v1 }
 0x665   : > { %v803_v9 = vpop.f32.mrb[4].mxu0 }
 0x666   : > { %v814_v10 = vadd.f32 %v3902_v25, %v803_v9  ;;  %v3177_v11 = vpop.f32.mrb[5].mxu0  ;;  %v807_v14 = vadd.f32 %v803_v9, %v487_v12 }
 0x668   : > { %816 = vrot.lane.b32.xlu0 %v814_v10, %s3730_s21  ;;  %v2956_v15 = vmul.f32 -1.442695, %v807_v14 }
 0x66a   : > { %3565 = vpow2.f32 %v2956_v15 }
 0x674   : > { %v3566_v19 = vpop.eup %3565 }
 0x675   : > { %v811_v20 = vadd.f32 1.0, %v3566_v19 }
 0x677   : > { %3567 = vrcp.f32 %v811_v20 }
 0x681   : > { %v3568_v26 = vpop.eup %3567 }
 0x682   : > { %v826_v33 = vsub.f32 1.0, %v3568_v26  ;;  %v832_v35 = vmul.f32 %v3568_v26, %v731_v5 }
 0x6da   : > { %v817_v27 = vpop.permute.xlu0 %816 }
 0x6db   : > { %v819_v28 = vmul.f32 %v3568_v26, %v817_v27 }
 0x6dd   : > { %821 = vrot.lane.b32.xlu1 %v819_v28, %s3730_s21  ;;  %v502_v28 = vadd.f32 %v3887_v17, %v3909_v29 }
 0x74f   : > { %v822_v30 = vpop.permute.xlu1 %821 }
 0x750   : > { %v824_v31 = vadd.f32 %v822_v30, %v487_v12 }
 0x752   : > { %3569 = vtanh.f32 %v824_v31 }
 0x75c   : > { %v3570_v32 = vpop.eup %3569 }
 0x75d   : > { %828 = vrot.lane.b32.xlu0 %v3570_v32, %s3731_s24 }
 0x7cf   : > { %v829_v34 = vpop.permute.xlu0 %828 }
 0x7d0   : > { %v831_v36 = vmul.f32 %v829_v34, %v826_v33 }
 0x7d2   : > { %v833_v37 = vadd.f32 %v832_v35, %v831_v36 }
 0x7d4   : > { %835 = vrot.lane.b32.xlu1 %v833_v37, %s3731_s24 }
 0x846   : > { %v836_v38 = vpop.permute.xlu1 %835 }
 0x847   : > { %3187 = vmatmul.mubr.msk.f32.vlgmr.msra.gmra.mrb[10].mxu1 %vm525_vm3, %v836_v38 }
 0x848   : > { %3416 = vmatpush3.bf16.msra.mxu1 %v3844_v4  ;;  %3208 = vmatprep.mubr.msk.f32.mxu1 %vm3728_vm2, %v3729_v16 }
 0x849   : > { %3417 = vmatprep.subr.bf16.mxu1 %v3727_v1 }
 0x84c   : > { %3419 = vmatpush3.bf16.msra.mxu1 %v3863_v13 }
 0x84d   : > { %3426 = vmatprep.subr.bf16.mxu1 %v3727_v1 }
 0x91a   : > { %v905_v39 = vpop.f32.mrb[10].mxu1 }
 0x91b   : > { %v916_v40 = vadd.f32 %v3902_v25, %v905_v39  ;;  %v3188_v41 = vpop.f32.mrb[11].mxu1  ;;  %v909_v43 = vadd.f32 %v905_v39, %v492_v42 }
 0x91d   : > { %918 = vrot.lane.b32.xlu0 %v916_v40, %s3730_s21  ;;  %v2958_v44 = vmul.f32 -1.442695, %v909_v43 }
 0x91f   : > { %3571 = vpow2.f32 %v2958_v44 }
 0x929   : > { %v3572_v45 = vpop.eup %3571 }
 0x92a   : > { %v913_v46 = vadd.f32 1.0, %v3572_v45 }
 0x92c   : > { %3573 = vrcp.f32 %v913_v46 }
 0x936   : > { %v3574_v47 = vpop.eup %3573 }
 0x937   : > { %v928_v53 = vsub.f32 1.0, %v3574_v47  ;;  %v934_v55 = vmul.f32 %v3574_v47, %v833_v37 }
 0x98f   : > { %v919_v48 = vpop.permute.xlu0 %918 }
 0x990   : > { %v921_v49 = vmul.f32 %v3574_v47, %v919_v48  ;;  %v507_v48 = vadd.f32 %v3909_v29, %v3893_v22 }
 0x992   : > { %923 = vrot.lane.b32.xlu1 %v921_v49, %s3730_s21 }
 0xa04   : > { %v924_v50 = vpop.permute.xlu1 %923 }
 0xa05   : > { %v926_v51 = vadd.f32 %v924_v50, %v492_v42 }
 0xa07   : > { %3575 = vtanh.f32 %v926_v51 }
 0xa11   : > { %v3576_v52 = vpop.eup %3575 }
 0xa12   : > { %930 = vrot.lane.b32.xlu0 %v3576_v52, %s3731_s24 }
 0xa84   : > { %v931_v54 = vpop.permute.xlu0 %930 }
 0xa85   : > { %v933_v56 = vmul.f32 %v931_v54, %v928_v53 }
 0xa87   : > { %v935_v57 = vadd.f32 %v934_v55, %v933_v56 }
 0xa89   : > { %937 = vrot.lane.b32.xlu1 %v935_v57, %s3731_s24 }
 0xafb   : > { %v938_v58 = vpop.permute.xlu1 %937 }
 0xafc   : > { %3198 = vmatmul.mubr.msk.f32.vlgmr.msra.gmra.mrb[6].mxu0 %vm525_vm3, %v938_v58 }
 0xafd   : > { %3422 = vmatpush3.bf16.msra.mxu0 %v3844_v4  ;;  %3219 = vmatprep.mubr.msk.f32.mxu0 %vm3728_vm2, %v3729_v16 }
 0xafe   : > { %3423 = vmatprep.subr.bf16.mxu0 %v3727_v1 }
 0xb01   : > { %3425 = vmatpush3.bf16.msra.mxu0 %v3863_v13 }
 0xb02   : > { %3432 = vmatprep.subr.bf16.mxu0 %v3727_v1 }
 0xbcf   : > { %v1007_v59 = vpop.f32.mrb[6].mxu0 }
 0xbd0   : > { %v1018_v60 = vadd.f32 %v3902_v25, %v1007_v59  ;;  %v3199_v61 = vpop.f32.mrb[7].mxu0  ;;  %v1011_v63 = vadd.f32 %v1007_v59, %v497_v62 }
 0xbd2   : > { %1020 = vrot.lane.b32.xlu0 %v1018_v60, %s3730_s21  ;;  %v2960_v0 = vmul.f32 -1.442695, %v1011_v63 }
 0xbd4   : > { %3577 = vpow2.f32 %v2960_v0 }
 0xbde   : > { %v3578_v2 = vpop.eup %3577 }
 0xbdf   : > { %v1015_v3 = vadd.f32 1.0, %v3578_v2 }
 0xbe1   : > { %3579 = vrcp.f32 %v1015_v3 }
 0xbeb   : > { %v3580_v5 = vpop.eup %3579 }
 0xbec   : > { %v1030_v11 = vsub.f32 1.0, %v3580_v5  ;;  %v1036_v18 = vmul.f32 %v3580_v5, %v935_v57 }
 0xc44   : > { %v1021_v6 = vpop.permute.xlu0 %1020 }
 0xc45   : > { %v1023_v7 = vmul.f32 %v3580_v5, %v1021_v6  ;;  %v512_v5 = vadd.f32 %v3891_v21, %v3909_v29 }
 0xc47   : > { %1025 = vrot.lane.b32.xlu1 %v1023_v7, %s3730_s21 }
 0xcb9   : > { %v1026_v8 = vpop.permute.xlu1 %1025 }
 0xcba   : > { %v1028_v9 = vadd.f32 %v1026_v8, %v497_v62 }
 0xcbc   : > { %3581 = vtanh.f32 %v1028_v9 }
 0xcc6   : > { %v3582_v10 = vpop.eup %3581 }
 0xcc7   : > { %1032 = vrot.lane.b32.xlu0 %v3582_v10, %s3731_s24 }
 0xd39   : > { %v1033_v12 = vpop.permute.xlu0 %1032 }
 0xd3a   : > { %v1035_v14 = vmul.f32 %v1033_v12, %v1030_v11 }
 0xd3c   : > { %v1037_v15 = vadd.f32 %v1036_v18, %v1035_v14 }
 0xd3e   : > { %1039 = vrot.lane.b32.xlu1 %v1037_v15, %s3731_s24 }
 0xdb0   : > { %v1040_v19 = vpop.permute.xlu1 %1039 }
 0xdb1   : > { %3209 = vmatmul.mubr.msk.f32.vlgmr.msra.gmra.mrb[12].mxu1 %vm525_vm3, %v1040_v19 }
 0xdb2   : > { %3428 = vmatpush3.bf16.msra.mxu1 %v3844_v4  ;;  %3230 = vmatprep.mubr.msk.f32.mxu1 %vm3728_vm2, %v3729_v16 }
 0xdb3   : > { %3429 = vmatprep.subr.bf16.mxu1 %v3727_v1 }
 0xdb6   : > { %3431 = vmatpush3.bf16.msra.mxu1 %v3863_v13 }
 0xdb7   : > { %3438 = vmatprep.subr.bf16.mxu1 %v3727_v1 }
 0xe84   : > { %v1109_v20 = vpop.f32.mrb[12].mxu1 }
 0xe85   : > { %v1120_v26 = vadd.f32 %v3902_v25, %v1109_v20  ;;  %v3210_v27 = vpop.f32.mrb[13].mxu1  ;;  %v1113_v30 = vadd.f32 %v1109_v20, %v502_v28 }
 0xe87   : > { %1122 = vrot.lane.b32.xlu0 %v1120_v26, %s3730_s21  ;;  %v2962_v31 = vmul.f32 -1.442695, %v1113_v30 }
 0xe89   : > { %3583 = vpow2.f32 %v2962_v31  ;;  %v517_v31 = vadd.f32 %v3909_v29, %v3897_v24 }
 0xe93   : > { %v3584_v32 = vpop.eup %3583 }
 0xe94   : > { %v1117_v33 = vadd.f32 1.0, %v3584_v32 }
 0xe96   : > { %3585 = vrcp.f32 %v1117_v33 }
 0xea0   : > { %v3586_v34 = vpop.eup %3585 }
 0xea1   : > { %v1132_v40 = vsub.f32 1.0, %v3586_v34  ;;  %v1138_v17 = vmul.f32 %v3586_v34, %v1037_v15 }
 0xef9   : > { %v1123_v35 = vpop.permute.xlu0 %1122 }
 0xefa   : > { %v1125_v36 = vmul.f32 %v3586_v34, %v1123_v35 }
 0xefc   : > { %1127 = vrot.lane.b32.xlu1 %v1125_v36, %s3730_s21 }
 0xf6e   : > { %v1128_v37 = vpop.permute.xlu1 %1127 }
 0xf6f   : > { %v1130_v38 = vadd.f32 %v1128_v37, %v502_v28 }
 0xf71   : > { %3587 = vtanh.f32 %v1130_v38 }
 0xf7b   : > { %v3588_v39 = vpop.eup %3587 }
 0xf7c   : > { %1134 = vrot.lane.b32.xlu0 %v3588_v39, %s3731_s24 }
 0xfee   : > { %v1135_v41 = vpop.permute.xlu0 %1134 }
 0xfef   : > { %v1137_v42 = vmul.f32 %v1135_v41, %v1132_v40 }
 0xff1   : > { %v1139_v43 = vadd.f32 %v1138_v17, %v1137_v42 }
 0xff3   : > { %1141 = vrot.lane.b32.xlu1 %v1139_v43, %s3731_s24 }
0x1065   : > { %v1142_v44 = vpop.permute.xlu1 %1141 }
0x1066   : > { %3220 = vmatmul.mubr.msk.f32.vlgmr.msra.gmra.mrb[8].mxu0 %vm525_vm3, %v1142_v44 }
0x1067   : > { %3434 = vmatpush3.bf16.msra.mxu0 %v3844_v4  ;;  %3241 = vmatprep.mubr.msk.f32.mxu0 %vm3728_vm2, %v3729_v16 }
0x1068   : > { %3435 = vmatprep.subr.bf16.mxu0 %v3727_v1 }
0x106b   : > { %3437 = vmatpush3.bf16.msra.mxu0 %v3863_v13 }
0x106c   : > { %3444 = vmatprep.subr.bf16.mxu0 %v3727_v1 }
0x1139   : > { %v1211_v45 = vpop.f32.mrb[8].mxu0 }
0x113a   : > { %v1222_v46 = vadd.f32 %v3902_v25, %v1211_v45  ;;  %v3221_v47 = vpop.f32.mrb[9].mxu0  ;;  %v1215_v49 = vadd.f32 %v1211_v45, %v507_v48 }
0x113c   : > { %1224 = vrot.lane.b32.xlu0 %v1222_v46, %s3730_s21  ;;  %v2964_v50 = vmul.f32 -1.442695, %v1215_v49  ;;  %v522_v49 = vadd.f32 %v3895_v23, %v3909_v29  ;;  %v1549_v23 = vld [vmem:[%s4338_s4 + $0x8] sm:$0xff]  ;;  %v1550_v29 = vld [vmem:[%s4338_s4 + $0x10] sm:$0xff] }
0x113e   : > { %3589 = vpow2.f32 %v2964_v50 }
0x1148   : > { %v3590_v51 = vpop.eup %3589 }
0x1149   : > { %v1219_v52 = vadd.f32 1.0, %v3590_v51 }
0x114b   : > { %3591 = vrcp.f32 %v1219_v52 }
0x1155   : > { %v3592_v53 = vpop.eup %3591 }
0x1156   : > { %v1234_v59 = vsub.f32 1.0, %v3592_v53  ;;  %v1240_v22 = vmul.f32 %v3592_v53, %v1139_v43 }
0x11ae   : > { %v1225_v54 = vpop.permute.xlu0 %1224 }
0x11af   : > { %v1227_v55 = vmul.f32 %v3592_v53, %v1225_v54 }
0x11b1   : > { %1229 = vrot.lane.b32.xlu1 %v1227_v55, %s3730_s21 }
0x1223   : > { %v1230_v56 = vpop.permute.xlu1 %1229 }
0x1224   : > { %v1232_v57 = vadd.f32 %v1230_v56, %v507_v48 }
0x1226   : > { %3593 = vtanh.f32 %v1232_v57 }
0x1230   : > { %v3594_v58 = vpop.eup %3593 }
0x1231   : > { %1236 = vrot.lane.b32.xlu0 %v3594_v58, %s3731_s24 }
0x12a3   : > { %v1237_v60 = vpop.permute.xlu0 %1236 }
0x12a4   : > { %v1239_v61 = vmul.f32 %v1237_v60, %v1234_v59  ;;  %v1551_v60 = vld [vmem:[%s4338_s4 + $0x18] sm:$0xff] }
0x12a6   : > { %v1241_v62 = vadd.f32 %v1240_v22, %v1239_v61  ;;  %v3448_v22 = vpack.c.bf16 %v1551_v60, %v1550_v29 }
0x12a8   : > { %1243 = vrot.lane.b32.xlu1 %v1241_v62, %s3731_s24 }
0x131a   : > { %v1244_v63 = vpop.permute.xlu1 %1243 }
0x131b   : > { %3231 = vmatmul.mubr.msk.f32.vlgmr.msra.gmra.mrb[14].mxu1 %vm525_vm3, %v1244_v63 }
0x131c   : > { %3440 = vmatpush3.bf16.msra.mxu1 %v3844_v4  ;;  %3252 = vmatprep.mubr.msk.f32.mxu1 %vm3728_vm2, %v3729_v16 }
0x131d   : > { %3441 = vmatprep.subr.bf16.mxu1 %v3727_v1 }
0x1320   : > { %3443 = vmatpush3.bf16.msra.mxu1 %v3863_v13 }
0x1321   : > { %3266 = vmatprep.subr.mxu1 %v3729_v16 }
0x13ee   : > { %v1313_v0 = vpop.f32.mrb[14].mxu1 }
0x13ef   : > { %v1324_v2 = vadd.f32 %v3902_v25, %v1313_v0  ;;  %v3232_v3 = vpop.f32.mrb[15].mxu1  ;;  %v1317_v6 = vadd.f32 %v1313_v0, %v512_v5 }
0x13f1   : > { %1326 = vrot.lane.b32.xlu0 %v1324_v2, %s3730_s21  ;;  %v2966_v4 = vmul.f32 -1.442695, %v1317_v6  ;;  %v1646_v6 = vld [vmem:[%s4339_s5 + $0x10] sm:$0xff] }
0x13f3   : > { %3595 = vpow2.f32 %v2966_v4  ;;  %v1647_v4 = vld [vmem:[%s4339_s5 + $0x18] sm:$0xff] }
0x13fd   : > { %v3596_v7 = vpop.eup %3595 }
0x13fe   : > { %v1321_v8 = vadd.f32 1.0, %v3596_v7  ;;  %v1648_v7 = vld [vmem:[%s4339_s5 + $0x20] sm:$0xff] }
0x1400   : > { %3597 = vrcp.f32 %v1321_v8  ;;  %v4063_v8 = vpack.c.bf16 %v1647_v4, %v1646_v6 }
0x140a   : > { %v3598_v9 = vpop.eup %3597 }
0x140b   : > { %v1336_v14 = vsub.f32 1.0, %v3598_v9  ;;  %v1342_v21 = vmul.f32 %v3598_v9, %v1241_v62 }
0x1463   : > { %v1327_v10 = vpop.permute.xlu0 %1326 }
0x1464   : > { %v1329_v13 = vmul.f32 %v3598_v9, %v1327_v10  ;;  %v1649_v9 = vld [vmem:[%s4339_s5 + $0x28] sm:$0xff] }
0x1465   : > { %v1645_v10 = vld [vmem:[%s4339_s5 + $0x8] sm:$0xf] }
0x1466   : > { %1331 = vrot.lane.b32.xlu1 %v1329_v13, %s3730_s21  ;;  %v4075_v13 = vpack.c.bf16 %v1649_v9, %v1648_v7 }
0x14d8   : > { %v1332_v11 = vpop.permute.xlu1 %1331 }
0x14d9   : > { %v1334_v12 = vadd.f32 %v1332_v11, %v512_v5  ;;  %v1652_v11 = vld [vmem:[%s343_s25] sm:$0xff]  ;;  %s2938_s25 = sshll.u32 %s4354_s20, 3 }
0x14da   : > { %s4246_s19 = scalar_lea.vmem %s4341_s7, %s2938_s25 }
0x14db   : > { %3599 = vtanh.f32 %v1334_v12  ;;  %v2971_v12 = vld [vmem:[%s4338_s4 + $0x20] ss:$0 sm:$0xff] }
0x14e5   : > { %v3600_v18 = vpop.eup %3599 }
0x14e6   : > { %1338 = vrot.lane.b32.xlu0 %v3600_v18, %s3731_s24 }
0x1558   : > { %v1339_v15 = vpop.permute.xlu0 %1338 }
0x1559   : > { %v1341_v19 = vmul.f32 %v1339_v15, %v1336_v14 }
0x155b   : > { %v1343_v20 = vadd.f32 %v1342_v21, %v1341_v19 }
0x155d   : > { %1345 = vrot.lane.b32.xlu1 %v1343_v20, %s3731_s24 }
0x15cf   : > { %v1346_v26 = vpop.permute.xlu1 %1345 }
0x15d0   : > { %3242 = vmatmul.mubr.msk.f32.vlgmr.msra.gmra.mrb[10].mxu0 %vm525_vm3, %v1346_v26 }
0x15d1   : > { %3263 = vmatprep.mubr.msk.f32.mxu0 %vm3728_vm2, %v3729_v16 }
0x16a3   : > { %v1415_v27 = vpop.f32.mrb[10].mxu0 }
0x16a4   : > { %v1426_v28 = vadd.f32 %v3902_v25, %v1415_v27  ;;  %v3243_v30 = vpop.f32.mrb[11].mxu0  ;;  %v1419_v32 = vadd.f32 %v1415_v27, %v517_v31 }
0x16a6   : > { %1428 = vrot.lane.b32.xlu0 %v1426_v28, %s3730_s21  ;;  %v2968_v33 = vmul.f32 -1.442695, %v1419_v32  ;;  %v4114_v28 = vld [vmem:[%s4339_s5 + $0x31] ss:$0 sm:$0xff] }
0x16a8   : > { %3601 = vpow2.f32 %v2968_v33 }
0x16b2   : > { %v3602_v34 = vpop.eup %3601 }
0x16b3   : > { %v1423_v35 = vadd.f32 1.0, %v3602_v34  ;;  %v1634_v34 = vld [vmem:[%s347_s22] sm:$0xff] }
0x16b5   : > { %3603 = vrcp.f32 %v1423_v35 }
0x16bf   : > { %v3604_v36 = vpop.eup %3603 }
0x16c0   : > { %v1438_v17 = vsub.f32 1.0, %v3604_v36  ;;  %v1444_v24 = vmul.f32 %v3604_v36, %v1343_v20  ;;  %v1644_v20 = vld [vmem:[%s4339_s5] sm:$0xff] }
0x1718   : > { %v1429_v37 = vpop.permute.xlu0 %1428 }
0x1719   : > { %v1431_v38 = vmul.f32 %v3604_v36, %v1429_v37 }
0x171b   : > { %1433 = vrot.lane.b32.xlu1 %v1431_v38, %s3730_s21  ;;  %v2976_v38 = vld [vmem:[%s4339_s5 + $0x30] ss:$0 sm:$0xff] }
0x178d   : > { %v1434_v39 = vpop.permute.xlu1 %1433 }
0x178e   : > { %v1436_v40 = vadd.f32 %v1434_v39, %v517_v31 }
0x1790   : > { %3605 = vtanh.f32 %v1436_v40 }
0x179a   : > { %v3606_v41 = vpop.eup %3605 }
0x179b   : > { %1440 = vrot.lane.b32.xlu0 %v3606_v41, %s3731_s24 }
0x180d   : > { %v1441_v42 = vpop.permute.xlu0 %1440 }
0x180e   : > { %v1443_v43 = vmul.f32 %v1441_v42, %v1438_v17 }
0x1810   : > { %v1445_v44 = vadd.f32 %v1444_v24, %v1443_v43 }
0x1812   : > { %1447 = vrot.lane.b32.xlu1 %v1445_v44, %s3731_s24 }
0x1884   : > { %v1448_v45 = vpop.permute.xlu1 %1447 }
0x1885   : > { %3253 = vmatmul.mubr.msk.f32.vlgmr.msra.gmra.mrb[16].mxu1 %vm525_vm3, %v1448_v45 }
0x1886   : > { %3268 = vmatprep.mubr.msk.f32.mxu1 %vm3728_vm2, %v3729_v16  ;;  %3267 = vmatpush3.msk.msra.mxu1 %vm1657_vm4, %v1645_v10 }
0x1887   : > { %3271 = vmatprep.subr.mxu1 %v3729_v16 }
0x1889   : > { %3269 = vmatmul.mubr.msk.f32.vlgmr.msra.gmra.mrb[18].mxu1 %vm1653_vm5, %v1652_v11 }
0x188a   : > { %3273 = vmatprep.mubr.msk.f32.mxu1 %vm3728_vm2, %v3729_v16  ;;  %3272 = vmatpush3.msra.mxu1 %v1644_v20 }
0x188b   : > { %3456 = vmatprep.subr.bf16.mxu1 %v3727_v1 }
0x1958   : > { %v1517_v46 = vpop.f32.mrb[16].mxu1 }
0x1959   : > { %v1528_v47 = vadd.f32 %v3902_v25, %v1517_v46  ;;  %v3254_v48 = vpop.f32.mrb[17].mxu1  ;;  %v1521_v50 = vadd.f32 %v1517_v46, %v522_v49  ;;  %v1548_v25 = vld [vmem:[%s4338_s4] sm:$0xff] }
0x195a   : > { %v3445_v59 = vpack.c.bf16 %v1549_v23, %v1548_v25 }
0x195b   : > { %1530 = vrot.lane.b32.xlu0 %v1528_v47, %s3730_s21  ;;  %v2970_v51 = vmul.f32 -1.442695, %v1521_v50 }
0x195c   : > { %3446 = vmatpush3.bf16.msra.mxu0 %v3445_v59  ;;  %v1727_v27 = vpop.f32.mrb[18].mxu1 }
0x195d   : > { %3607 = vpow2.f32 %v2970_v51  ;;  %3447 = vmatprep.subr.bf16.mxu0 %v3727_v1  ;;  %v3270_v30 = vpop.f32.mrb[19].mxu1 }
0x1960   : > { %3449 = vmatpush3.bf16.msra.mxu0 %v3448_v22 }
0x1961   : > { %3450 = vmatprep.subr.bf16.mxu0 %v3727_v1 }
0x1967   : > { %v3608_v52 = vpop.eup %3607 }
0x1968   : > { %v1525_v53 = vadd.f32 1.0, %v3608_v52 }
0x196a   : > { %3609 = vrcp.f32 %v1525_v53 }
0x1974   : > { %v3610_v54 = vpop.eup %3609 }
0x1975   : > { %v1540_v62 = vsub.f32 1.0, %v3610_v54  ;;  %v1546_v0 = vmul.f32 %v3610_v54, %v1445_v44 }
0x19cd   : > { %v1531_v55 = vpop.permute.xlu0 %1530 }
0x19ce   : > { %v1533_v56 = vmul.f32 %v3610_v54, %v1531_v55 }
0x19d0   : > { %1535 = vrot.lane.b32.xlu1 %v1533_v56, %s3730_s21 }
0x1a42   : > { %v1536_v57 = vpop.permute.xlu1 %1535 }
0x1a43   : > { %v1538_v58 = vadd.f32 %v1536_v57, %v522_v49 }
0x1a45   : > { %3611 = vtanh.f32 %v1538_v58 }
0x1a4f   : > { %v3612_v61 = vpop.eup %3611 }
0x1a50   : > { %1542 = vrot.lane.b32.xlu0 %v3612_v61, %s3731_s24 }
0x1ac2   : > { %v1543_v63 = vpop.permute.xlu0 %1542 }
0x1ac3   : > { %v1545_v2 = vmul.f32 %v1543_v63, %v1540_v62 }
0x1ac5   : > { %v1547_v3 = vadd.f32 %v1546_v0, %v1545_v2 }
0x1ac7   : > { %1558 = vrot.lane.b32.xlu1 %v1547_v3, %s3731_s24 }
0x1b39   : > { %v1559_v5 = vpop.permute.xlu1 %1558 }
0x1b3a   : > { %3264 = vmatmul.mubr.msk.f32.vlgmr.msra.gmra.mrb[12].mxu0 %vm525_vm3, %v1559_v5 }
0x1b3b   : > { %3284 = vmatprep.mubr.msk.f32.mxu0 %vm3728_vm2, %v3729_v16  ;;  %3452 = vmatpush3.bf16.msra.mxu0 %v4063_v8 }
0x1b3c   : > { %3453 = vmatprep.subr.bf16.mxu0 %v3727_v1 }
0x1b3f   : > { %3455 = vmatpush3.bf16.msra.mxu0 %v4075_v13 }
0x1b40   : > { %3462 = vmatprep.subr.bf16.mxu0 %v3727_v1 }
0x1b42   : > { %3285 = vmatmul.mubr.f32.vlgmr.msra.gmra.mrb[14].mxu0 %v3729_v16 }
0x1b43   : > { %3464 = vmatpush3.bf16.msra.mxu0 %v4063_v8  ;;  %3306 = vmatprep.mubr.msk.f32.mxu0 %vm3728_vm2, %v3729_v16 }
0x1b44   : > { %3465 = vmatprep.subr.bf16.mxu0 %v3727_v1 }
0x1b47   : > { %3467 = vmatpush3.bf16.msra.mxu0 %v4075_v13 }
0x1b48   : > { %3474 = vmatprep.subr.bf16.mxu0 %v3727_v1 }
0x1c0d   : > { %v1628_v18 = vpop.f32.mrb[12].mxu0 }
0x1c0e   : > { %v1629_v14 = vadd.f32 %v2971_v12, %v1628_v18  ;;  %v3265_v15 = vpop.f32.mrb[13].mxu0 }
0x1c10   : > { %v1635_v21 = vmul.f32 0.5, %v1629_v14  ;;  %1633 = vst.msk [vmem:[%s333_s17] sm:$0xff] %vm1632_vm6, %v1629_v14 }
0x1c12   : > { %v1636_v19 = vmul.f32 1.442695, %v1635_v21 }
0x1c14   : > { %3613 = vpow2.f32 %v1636_v19 }
0x1c15   : > { %v1876_v31 = vpop.f32.mrb[14].mxu0 }
0x1c16   : > { %v1891_v32 = vadd.f32 %v4114_v28, %v1876_v31  ;;  %v3286_v33 = vpop.f32.mrb[15].mxu0 }
0x1c18   : > { %1893 = vrot.lane.b32.xlu1 %v1891_v32, %s3730_s21 }
0x1c1e   : > { %v3614_v26 = vpop.eup %3613 }
0x1c1f   : > { %1639 = vrot.lane.b32.xlu0 %v3614_v26, %s3732_s23  ;;  %s2821_s23 = sshll.u32 %s333_s17, 4  ;;  %s2822_s23 = int_to_ptr.vmem [resolvable:$true] %s2821_s23 }
0x1c20   : > { %s3663_s18 = scalar_lea.vmem %s2822_s23, 128 }
0x1c21   : > { %p3664_p13 = scmp.ne.s32.totalorder %s2822_s23, %s3663_s18 }
0x1c23   : > { %p3665_p0 = pnand %p3664_p13, %p3817_p5 }
0x1c25   : > { %p3666_p1 = pneg %p3665_p0 }
0x1c8a   : > { %v1894_v45 = vpop.permute.xlu1 %1893 }
0x1c91   : > { %v1640_v35 = vpop.permute.xlu0 %1639 }
0x1c92   : > { %v1642_v36 = vmul.f32 %v1640_v35, %v1634_v34 }
0x1c94   : > { %v1643_v37 = vadd.f32 %v1642_v36, %v1629_v14 }
0x1c96   : > { %3274 = vmatmul.mubr.msk.f32.vlgmr.msra.gmra.mrb[20].mxu1 %vm1731_vm7, %v1643_v37 }
0x1c97   : > { %3458 = vmatpush3.bf16.msra.mxu1 %v4063_v8  ;;  %3295 = vmatprep.mubr.msk.f32.mxu1 %vm3728_vm2, %v3729_v16 }
0x1c98   : > { %3459 = vmatprep.subr.bf16.mxu1 %v3727_v1 }
0x1c9b   : > { %3461 = vmatpush3.bf16.msra.mxu1 %v4075_v13 }
0x1c9c   : > { %3468 = vmatprep.subr.bf16.mxu1 %v3727_v1 }
0x1d69   : > { %v1801_v39 = vpop.f32.mrb[20].mxu1 }
0x1d6a   : > { %v1802_v40 = vadd.f32 %v1801_v39, %v1727_v27  ;;  %v3275_v41 = vpop.f32.mrb[21].mxu1 }
0x1d6c   : > { %v4132_v17 = vadd.f32 %v2976_v38, %v1802_v40 }
0x1d6e   : > { %v1880_v42 = vadd.f32 %v1876_v31, %v4132_v17 }
0x1d70   : > { %v2977_v24 = vmul.f32 -1.442695, %v1880_v42 }
0x1d72   : > { %3615 = vpow2.f32 %v2977_v24 }
0x1d7c   : > { %v3616_v43 = vpop.eup %3615 }
0x1d7d   : > { %v1884_v44 = vadd.f32 1.0, %v3616_v43 }
0x1d7f   : > { %3617 = vrcp.f32 %v1884_v44 }
0x1d89   : > { %v3618_v46 = vpop.eup %3617 }
0x1d8a   : > { %v1896_v47 = vmul.f32 %v3618_v46, %v1894_v45  ;;  %v1903_v51 = vsub.f32 1.0, %v3618_v46  ;;  %v1909_v53 = vmul.f32 0.0, %v3618_v46 }
0x1d8c   : > { %1898 = vrot.lane.b32.xlu0 %v1896_v47, %s3730_s21 }
0x1dfe   : > { %v1899_v48 = vpop.permute.xlu0 %1898 }
0x1dff   : > { %v1901_v49 = vadd.f32 %v1899_v48, %v4132_v17 }
0x1e01   : > { %3619 = vtanh.f32 %v1901_v49 }
0x1e0b   : > { %v3620_v50 = vpop.eup %3619 }
0x1e0c   : > { %1905 = vrot.lane.b32.xlu1 %v3620_v50, %s3731_s24 }
0x1e7e   : > { %v1906_v52 = vpop.permute.xlu1 %1905 }
0x1e7f   : > { %v1908_v54 = vmul.f32 %v1906_v52, %v1903_v51 }
0x1e81   : > { %v1910_v55 = vadd.f32 %v1909_v53, %v1908_v54 }
0x1e83   : > { %1912 = vrot.lane.b32.xlu0 %v1910_v55, %s3731_s24 }
0x1ef5   : > { %v1913_v56 = vpop.permute.xlu0 %1912 }
0x1ef6   : > { %1915 = vst.msk [vmem:[#allocation2] sm:$0xff] %vm525_vm3, %v1913_v56  ;;  %3296 = vmatmul.mubr.msk.f32.vlgmr.msra.gmra.mrb[22].mxu1 %vm525_vm3, %v1913_v56 }
0x1ef7   : > { %3470 = vmatpush3.bf16.msra.mxu1 %v4063_v8  ;;  %3317 = vmatprep.mubr.msk.f32.mxu1 %vm3728_vm2, %v3729_v16 }
0x1ef8   : > { %3471 = vmatprep.subr.bf16.mxu1 %v3727_v1 }
0x1efb   : > { %3473 = vmatpush3.bf16.msra.mxu1 %v4075_v13 }
0x1efc   : > { %3480 = vmatprep.subr.bf16.mxu1 %v3727_v1 }
0x1fc9   : > { %v1984_v57 = vpop.f32.mrb[22].mxu1 }
0x1fca   : > { %v1995_v58 = vadd.f32 %v4114_v28, %v1984_v57  ;;  %v3297_v25 = vpop.f32.mrb[23].mxu1  ;;  %v1988_v23 = vadd.f32 %v1984_v57, %v4132_v17 }
0x1fcc   : > { %1997 = vrot.lane.b32.xlu1 %v1995_v58, %s3730_s21  ;;  %v2980_v29 = vmul.f32 -1.442695, %v1988_v23 }
0x1fce   : > { %3621 = vpow2.f32 %v2980_v29 }
0x1fd8   : > { %v3622_v59 = vpop.eup %3621 }
0x1fd9   : > { %v1992_v60 = vadd.f32 1.0, %v3622_v59 }
0x1fdb   : > { %3623 = vrcp.f32 %v1992_v60 }
0x1fe5   : > { %v3624_v22 = vpop.eup %3623 }
0x1fe6   : > { %v2007_v3 = vsub.f32 1.0, %v3624_v22  ;;  %v2013_v6 = vmul.f32 %v3624_v22, %v1910_v55 }
0x203e   : > { %v1998_v61 = vpop.permute.xlu1 %1997 }
0x203f   : > { %v2000_v62 = vmul.f32 %v3624_v22, %v1998_v61 }
0x2041   : > { %2002 = vrot.lane.b32.xlu0 %v2000_v62, %s3730_s21 }
0x20b3   : > { %v2003_v63 = vpop.permute.xlu0 %2002 }
0x20b4   : > { %v2005_v0 = vadd.f32 %v2003_v63, %v4132_v17 }
0x20b6   : > { %3625 = vtanh.f32 %v2005_v0 }
0x20c0   : > { %v3626_v2 = vpop.eup %3625 }
0x20c1   : > { %2009 = vrot.lane.b32.xlu1 %v3626_v2, %s3731_s24 }
0x2133   : > { %v2010_v5 = vpop.permute.xlu1 %2009 }
0x2134   : > { %v2012_v4 = vmul.f32 %v2010_v5, %v2007_v3 }
0x2136   : > { %v2014_v7 = vadd.f32 %v2013_v6, %v2012_v4 }
0x2138   : > { %2016 = vrot.lane.b32.xlu0 %v2014_v7, %s3731_s24 }
0x21aa   : > { %v2017_v9 = vpop.permute.xlu0 %2016 }
0x21ab   : > { %2019 = vst.msk [vmem:[#allocation2 + $0x8] sm:$0xff] %vm525_vm3, %v2017_v9  ;;  %3307 = vmatmul.mubr.msk.f32.vlgmr.msra.gmra.mrb[16].mxu0 %vm525_vm3, %v2017_v9 }
0x21ac   : > { %3476 = vmatpush3.bf16.msra.mxu0 %v4063_v8  ;;  %3328 = vmatprep.mubr.msk.f32.mxu0 %vm3728_vm2, %v3729_v16 }
0x21ad   : > { %3477 = vmatprep.subr.bf16.mxu0 %v3727_v1 }
0x21b0   : > { %3479 = vmatpush3.bf16.msra.mxu0 %v4075_v13 }
0x21b1   : > { %3486 = vmatprep.subr.bf16.mxu0 %v3727_v1 }
0x227e   : > { %v2088_v10 = vpop.f32.mrb[16].mxu0 }
0x227f   : > { %v2099_v11 = vadd.f32 %v4114_v28, %v2088_v10  ;;  %v3308_v12 = vpop.f32.mrb[17].mxu0  ;;  %v2092_v18 = vadd.f32 %v2088_v10, %v4132_v17 }
0x2281   : > { %2101 = vrot.lane.b32.xlu1 %v2099_v11, %s3730_s21  ;;  %v2982_v14 = vmul.f32 -1.442695, %v2092_v18 }
0x2283   : > { %3627 = vpow2.f32 %v2982_v14 }
0x228d   : > { %v3628_v15 = vpop.eup %3627 }
0x228e   : > { %v2096_v21 = vadd.f32 1.0, %v3628_v15 }
0x2290   : > { %3629 = vrcp.f32 %v2096_v21 }
0x229a   : > { %v3630_v19 = vpop.eup %3629 }
0x229b   : > { %v2111_v32 = vsub.f32 1.0, %v3630_v19  ;;  %v2117_v34 = vmul.f32 %v3630_v19, %v2014_v7 }
0x22f3   : > { %v2102_v20 = vpop.permute.xlu1 %2101 }
0x22f4   : > { %v2104_v26 = vmul.f32 %v3630_v19, %v2102_v20  ;;  %v2644_v19 = vld [vmem:[%s4340_s6] sm:$0xff]  ;;  %v2645_v20 = vld [vmem:[%s4340_s6 + $0x8] sm:$0xff] }
0x22f6   : > { %2106 = vrot.lane.b32.xlu0 %v2104_v26, %s3730_s21  ;;  %v3498_v26 = vpack.c.bf16 %v2645_v20, %v2644_v19 }
0x2368   : > { %v2107_v27 = vpop.permute.xlu0 %2106 }
0x2369   : > { %v2109_v30 = vadd.f32 %v2107_v27, %v4132_v17 }
0x236b   : > { %3631 = vtanh.f32 %v2109_v30 }
0x2375   : > { %v3632_v31 = vpop.eup %3631 }
0x2376   : > { %2113 = vrot.lane.b32.xlu1 %v3632_v31, %s3731_s24 }
0x23e8   : > { %v2114_v33 = vpop.permute.xlu1 %2113 }
0x23e9   : > { %v2116_v35 = vmul.f32 %v2114_v33, %v2111_v32 }
0x23eb   : > { %v2118_v36 = vadd.f32 %v2117_v34, %v2116_v35  ;;  %v2646_v35 = vld [vmem:[%s4340_s6 + $0x10] sm:$0xff] }
0x23ed   : > { %2120 = vrot.lane.b32.xlu0 %v2118_v36, %s3731_s24 }
0x245f   : > { %v2121_v37 = vpop.permute.xlu0 %2120 }
0x2460   : > { %2123 = vst.msk [vmem:[#allocation2 + $0x10] sm:$0xff] %vm525_vm3, %v2121_v37  ;;  %3318 = vmatmul.mubr.msk.f32.vlgmr.msra.gmra.mrb[24].mxu1 %vm525_vm3, %v2121_v37 }
0x2461   : > { %3482 = vmatpush3.bf16.msra.mxu1 %v4063_v8  ;;  %3339 = vmatprep.mubr.msk.f32.mxu1 %vm3728_vm2, %v3729_v16 }
0x2462   : > { %3483 = vmatprep.subr.bf16.mxu1 %v3727_v1 }
0x2465   : > { %3485 = vmatpush3.bf16.msra.mxu1 %v4075_v13 }
0x2466   : > { %3492 = vmatprep.subr.bf16.mxu1 %v3727_v1 }
0x2533   : > { %v2192_v38 = vpop.f32.mrb[24].mxu1 }
0x2534   : > { %v2203_v39 = vadd.f32 %v4114_v28, %v2192_v38  ;;  %v3319_v40 = vpop.f32.mrb[25].mxu1  ;;  %v2196_v41 = vadd.f32 %v2192_v38, %v4132_v17 }
0x2535   : > { %v2650_v40 = vld [vmem:[#allocation2 + $0x8] sm:$0xff] }
0x2536   : > { %2205 = vrot.lane.b32.xlu1 %v2203_v39, %s3730_s21  ;;  %v2984_v42 = vmul.f32 -1.442695, %v2196_v41  ;;  %v2649_v39 = vld [vmem:[#allocation2] sm:$0xff]  ;;  %v2651_v41 = vld [vmem:[#allocation2 + $0x10] sm:$0xff] }
0x2538   : > { %3633 = vpow2.f32 %v2984_v42 }
0x2542   : > { %v3634_v24 = vpop.eup %3633 }
0x2543   : > { %v2200_v43 = vadd.f32 1.0, %v3634_v24 }
0x2545   : > { %3635 = vrcp.f32 %v2200_v43 }
0x254f   : > { %v3636_v44 = vpop.eup %3635 }
0x2550   : > { %v2215_v50 = vsub.f32 1.0, %v3636_v44  ;;  %v2221_v52 = vmul.f32 %v3636_v44, %v2118_v36  ;;  %v2647_v36 = vld [vmem:[%s4340_s6 + $0x18] sm:$0xff] }
0x2551   : > { %v3502_v37 = vpack.c.bf16 %v2647_v36, %v2646_v35 }
0x25a8   : > { %v2206_v45 = vpop.permute.xlu1 %2205 }
0x25a9   : > { %v2208_v46 = vmul.f32 %v3636_v44, %v2206_v45 }
0x25ab   : > { %2210 = vrot.lane.b32.xlu0 %v2208_v46, %s3730_s21 }
0x261d   : > { %v2211_v47 = vpop.permute.xlu0 %2210 }
0x261e   : > { %v2213_v48 = vadd.f32 %v2211_v47, %v4132_v17  ;;  %v4241_v47 = vld [vmem:[%s4340_s6 + $0x20] ss:$0 sm:$0xff] }
0x2620   : > { %3637 = vtanh.f32 %v2213_v48 }
0x262a   : > { %v3638_v49 = vpop.eup %3637 }
0x262b   : > { %2217 = vrot.lane.b32.xlu1 %v3638_v49, %s3731_s24 }
0x269d   : > { %v2218_v51 = vpop.permute.xlu1 %2217 }
0x269e   : > { %v2220_v53 = vmul.f32 %v2218_v51, %v2215_v50 }
0x26a0   : > { %v2222_v54 = vadd.f32 %v2221_v52, %v2220_v53 }
0x26a2   : > { %2224 = vrot.lane.b32.xlu0 %v2222_v54, %s3731_s24 }
0x2714   : > { %v2225_v55 = vpop.permute.xlu0 %2224 }
0x2715   : > { %2227 = vst.msk [vmem:[#allocation2 + $0x18] sm:$0xff] %vm525_vm3, %v2225_v55  ;;  %3329 = vmatmul.mubr.msk.f32.vlgmr.msra.gmra.mrb[18].mxu0 %vm525_vm3, %v2225_v55 }
0x2716   : > { %3488 = vmatpush3.bf16.msra.mxu0 %v4063_v8  ;;  %3350 = vmatprep.mubr.msk.f32.mxu0 %vm3728_vm2, %v3729_v16 }
0x2717   : > { %3489 = vmatprep.subr.bf16.mxu0 %v3727_v1 }
0x271a   : > { %3491 = vmatpush3.bf16.msra.mxu0 %v4075_v13 }
0x271b   : > { %3499 = vmatprep.subr.bf16.mxu0 %v3498_v26 }
0x271c   : > { %v2652_v42 = vld [vmem:[#allocation2 + $0x18] sm:$0xff] }
0x27e8   : > { %v2296_v56 = vpop.f32.mrb[18].mxu0 }
0x27e9   : > { %v2307_v57 = vadd.f32 %v4114_v28, %v2296_v56  ;;  %v3330_v58 = vpop.f32.mrb[19].mxu0  ;;  %v2300_v25 = vadd.f32 %v2296_v56, %v4132_v17 }
0x27eb   : > { %2309 = vrot.lane.b32.xlu1 %v2307_v57, %s3730_s21  ;;  %v2986_v23 = vmul.f32 -1.442695, %v2300_v25 }
0x27ed   : > { %3639 = vpow2.f32 %v2986_v23 }
0x27f7   : > { %v3640_v29 = vpop.eup %3639 }
0x27f8   : > { %v2304_v59 = vadd.f32 1.0, %v3640_v29 }
0x27fa   : > { %3641 = vrcp.f32 %v2304_v59 }
0x2804   : > { %v3642_v60 = vpop.eup %3641 }
0x2805   : > { %v2319_v2 = vsub.f32 1.0, %v3642_v60  ;;  %v2325_v5 = vmul.f32 %v3642_v60, %v2222_v54 }
0x285d   : > { %v2310_v22 = vpop.permute.xlu1 %2309 }
0x285e   : > { %v2312_v61 = vmul.f32 %v3642_v60, %v2310_v22 }
0x2860   : > { %2314 = vrot.lane.b32.xlu0 %v2312_v61, %s3730_s21 }
0x28d2   : > { %v2315_v62 = vpop.permute.xlu0 %2314 }
0x28d3   : > { %v2317_v63 = vadd.f32 %v2315_v62, %v4132_v17 }
0x28d5   : > { %3643 = vtanh.f32 %v2317_v63 }
0x28df   : > { %v3644_v0 = vpop.eup %3643 }
0x28e0   : > { %2321 = vrot.lane.b32.xlu1 %v3644_v0, %s3731_s24 }
0x2952   : > { %v2322_v3 = vpop.permute.xlu1 %2321 }
0x2953   : > { %v2324_v6 = vmul.f32 %v2322_v3, %v2319_v2 }
0x2955   : > { %v2326_v4 = vadd.f32 %v2325_v5, %v2324_v6 }
0x2957   : > { %2328 = vrot.lane.b32.xlu0 %v2326_v4, %s3731_s24 }
0x29c9   : > { %v2329_v7 = vpop.permute.xlu0 %2328 }
0x29ca   : > { %2331 = vst.msk [vmem:[#allocation2 + $0x20] sm:$0xff] %vm525_vm3, %v2329_v7  ;;  %3340 = vmatmul.mubr.msk.f32.vlgmr.msra.gmra.mrb[26].mxu1 %vm525_vm3, %v2329_v7 }
0x29cb   : > { %3494 = vmatpush3.bf16.msra.mxu1 %v4063_v8  ;;  %3361 = vmatprep.mubr.msk.f32.mxu1 %vm3728_vm2, %v3729_v16 }
0x29cc   : > { %3495 = vmatprep.subr.bf16.mxu1 %v3727_v1 }
0x29cf   : > { %3497 = vmatpush3.bf16.msra.mxu1 %v4075_v13 }
0x29d1   : > { %v2653_v24 = vld [vmem:[#allocation2 + $0x20] sm:$0xff] }
0x2a9d   : > { %v2400_v9 = vpop.f32.mrb[26].mxu1 }
0x2a9e   : > { %v2411_v10 = vadd.f32 %v4114_v28, %v2400_v9  ;;  %v3341_v11 = vpop.f32.mrb[27].mxu1  ;;  %v2404_v12 = vadd.f32 %v2400_v9, %v4132_v17 }
0x2aa0   : > { %2413 = vrot.lane.b32.xlu1 %v2411_v10, %s3730_s21  ;;  %v2988_v18 = vmul.f32 -1.442695, %v2404_v12 }
0x2aa2   : > { %3645 = vpow2.f32 %v2988_v18 }
0x2aac   : > { %v3646_v14 = vpop.eup %3645 }
0x2aad   : > { %v2408_v15 = vadd.f32 1.0, %v3646_v14 }
0x2aaf   : > { %3647 = vrcp.f32 %v2408_v15 }
0x2ab9   : > { %v3648_v8 = vpop.eup %3647 }
0x2aba   : > { %v2423_v30 = vsub.f32 1.0, %v3648_v8  ;;  %v2429_v32 = vmul.f32 %v3648_v8, %v2326_v4 }
0x2b12   : > { %v2414_v21 = vpop.permute.xlu1 %2413 }
0x2b13   : > { %v2416_v16 = vmul.f32 %v3648_v8, %v2414_v21 }
0x2b15   : > { %2418 = vrot.lane.b32.xlu0 %v2416_v16, %s3730_s21 }
0x2b87   : > { %v2419_v1 = vpop.permute.xlu0 %2418 }
0x2b88   : > { %v2421_v13 = vadd.f32 %v2419_v1, %v4132_v17 }
0x2b8a   : > { %3649 = vtanh.f32 %v2421_v13 }
0x2b94   : > { %v3650_v27 = vpop.eup %3649 }
0x2b95   : > { %2425 = vrot.lane.b32.xlu1 %v3650_v27, %s3731_s24 }
0x2c07   : > { %v2426_v31 = vpop.permute.xlu1 %2425 }
0x2c08   : > { %v2428_v33 = vmul.f32 %v2426_v31, %v2423_v30 }
0x2c0a   : > { %v4217_v34 = vadd.f32 %v2429_v32, %v2428_v33 }
0x2c0c   : > { %2432 = vrot.lane.b32.xlu0 %v4217_v34, %s3731_s24 }
0x2c7e   : > { %v2433_v38 = vpop.permute.xlu0 %2432 }
0x2c7f   : > { %2435 = vst.msk [vmem:[#allocation2 + $0x28] sm:$0xff] %vm525_vm3, %v2433_v38  ;;  %3351 = vmatmul.mubr.msk.f32.vlgmr.msra.gmra.mrb[20].mxu0 %vm525_vm3, %v2433_v38 }
0x2c80   : > { %3501 = vmatpush3.bf16.msra.mxu0 %v3498_v26  ;;  %3372 = vmatprep.mubr.msk.f32.mxu0 %vm525_vm3, %v2649_v39 }
0x2c81   : > { %3503 = vmatprep.subr.bf16.mxu0 %v3502_v37 }
0x2c84   : > { %3505 = vmatpush3.bf16.msra.mxu0 %v3502_v37 }
0x2c86   : > { %v2654_v43 = vld [vmem:[#allocation2 + $0x28] sm:$0xff] }
0x2c87   : > { %3373 = vmatmul.mubr.msk.f32.vlgmr.msra.gmra.mrb[22].mxu0 %vm525_vm3, %v2650_v40 }
0x2c88   : > { %3375 = vmatprep.mubr.msk.f32.mxu0 %vm525_vm3, %v2651_v41 }
0x2c8b   : > { %3376 = vmatmul.mubr.msk.f32.gmra.mrb[24].mxu0 %vm525_vm3, %v2652_v42 }
0x2c8c   : > { %3378 = vmatprep.mubr.msk.f32.mxu0 %vm525_vm3, %v2653_v24 }
0x2c8f   : > { %3379 = vmatmul.mubr.msk.f32.gmra.mrb[26].mxu0 %vm525_vm3, %v2654_v43 }
0x2d52   : > { %v2504_v44 = vpop.f32.mrb[20].mxu0 }
0x2d53   : > { %v2515_v45 = vadd.f32 %v4114_v28, %v2504_v44  ;;  %v3352_v46 = vpop.f32.mrb[21].mxu0  ;;  %v2508_v23 = vadd.f32 %v2504_v44, %v4132_v17 }
0x2d55   : > { %2517 = vrot.lane.b32.xlu1 %v2515_v45, %s3730_s21  ;;  %v2990_v29 = vmul.f32 -1.442695, %v2508_v23 }
0x2d57   : > { %3651 = vpow2.f32 %v2990_v29 }
0x2d5a   : > { %v3374_v48 = vpop.f32.mrb[22].mxu0 }
0x2d5b   : > { %v2757_v49 = vadd.f32 %v3374_v48, %v4241_v47  ;;  %v2751_v50 = vpop.f32.mrb[23].mxu0 }
0x2d5c   : > { %v2752_v51 = vadd.f32 %v4241_v47, %v2751_v50 }
0x2d5d   : > { %2791 = vst.msk [vmem:[%s4246_s19 + $0x8] sm:$0xff] %vm375_vm1, %v2757_v49 }
0x2d5e   : > { %2790 = vst.msk [vmem:[%s4246_s19] sm:$0xff] %vm375_vm1, %v2752_v51  ;;  %v3377_v52 = vpop.f32.mrb[24].mxu0 }
0x2d5f   : > { %v2767_v53 = vadd.f32 %v3377_v52, %v4241_v47  ;;  %v2761_v54 = vpop.f32.mrb[25].mxu0 }
0x2d60   : > { %v2762_v55 = vadd.f32 %v4241_v47, %v2761_v54 }
0x2d61   : > { %2793 = vst.msk [vmem:[%s4246_s19 + $0x18] sm:$0xff] %vm375_vm1, %v2767_v53  ;;  %v3652_v59 = vpop.eup %3651 }
0x2d62   : > { %2792 = vst.msk [vmem:[%s4246_s19 + $0x10] sm:$0xff] %vm375_vm1, %v2762_v55  ;;  %v3380_v56 = vpop.f32.mrb[26].mxu0  ;;  %v2512_v60 = vadd.f32 1.0, %v3652_v59 }
0x2d63   : > { %v2777_v57 = vadd.f32 %v3380_v56, %v4241_v47  ;;  %v2771_v58 = vpop.f32.mrb[27].mxu0 }
0x2d64   : > { %v2772_v25 = vadd.f32 %v4241_v47, %v2771_v58  ;;  %3653 = vrcp.f32 %v2512_v60 }
0x2d65   : > { %2795 = vst.msk [vmem:[%s4246_s19 + $0x28] sm:$0xff] %vm375_vm1, %v2777_v57 }
0x2d66   : > { %2794 = vst.msk [vmem:[%s4246_s19 + $0x20] sm:$0xff] %vm375_vm1, %v2772_v25 }
0x2d6e   : > { %v3654_v22 = vpop.eup %3653 }
0x2d6f   : > { %v2527_v3 = vsub.f32 1.0, %v3654_v22  ;;  %v2533_v6 = vmul.f32 %v3654_v22, %v4217_v34 }
0x2dc7   : > { %v2518_v61 = vpop.permute.xlu1 %2517 }
0x2dc8   : > { %v2520_v62 = vmul.f32 %v3654_v22, %v2518_v61 }
0x2dca   : > { %2522 = vrot.lane.b32.xlu0 %v2520_v62, %s3730_s21 }
0x2e3c   : > { %v2523_v63 = vpop.permute.xlu0 %2522 }
0x2e3d   : > { %v2525_v0 = vadd.f32 %v2523_v63, %v4132_v17 }
0x2e3f   : > { %3655 = vtanh.f32 %v2525_v0 }
0x2e49   : > { %v3656_v2 = vpop.eup %3655 }
0x2e4a   : > { %2529 = vrot.lane.b32.xlu1 %v3656_v2, %s3731_s24 }
0x2ebc   : > { %v2530_v5 = vpop.permute.xlu1 %2529 }
0x2ebd   : > { %v2532_v4 = vmul.f32 %v2530_v5, %v2527_v3 }
0x2ebf   : > { %v2534_v7 = vadd.f32 %v2533_v6, %v2532_v4 }
0x2ec1   : > { %2536 = vrot.lane.b32.xlu0 %v2534_v7, %s3731_s24 }
0x2f33   : > { %v2537_v9 = vpop.permute.xlu0 %2536 }
0x2f34   : > { %2539 = vst.msk [vmem:[#allocation2 + $0x30] sm:$0xff] %vm525_vm3, %v2537_v9  ;;  %3362 = vmatmul.mubr.msk.f32.vlgmr.msra.gmra.mrb[28].mxu1 %vm525_vm3, %v2537_v9 }
0x2f3b   : > { %v2655_v10 = vld [vmem:[#allocation2 + $0x30] sm:$0xff] }
0x2f3c   : > { %3381 = vmatprep.mubr.msk.f32.mxu0 %vm525_vm3, %v2655_v10 }
0x3007   : > { %v2608_v11 = vpop.f32.mrb[28].mxu1 }
0x3008   : > { %v2619_v12 = vadd.f32 %v4114_v28, %v2608_v11  ;;  %v3363_v18 = vpop.f32.mrb[29].mxu1  ;;  %v2612_v14 = vadd.f32 %v2608_v11, %v4132_v17 }
0x300a   : > { %2621 = vrot.lane.b32.xlu1 %v2619_v12, %s3730_s21  ;;  %v2992_v15 = vmul.f32 -1.442695, %v2612_v14 }
0x300c   : > { %3657 = vpow2.f32 %v2992_v15 }
0x3016   : > { %v3658_v8 = vpop.eup %3657 }
0x3017   : > { %v2616_v21 = vadd.f32 1.0, %v3658_v8 }
0x3019   : > { %3659 = vrcp.f32 %v2616_v21 }
0x3023   : > { %v3660_v16 = vpop.eup %3659 }
0x3024   : > { %v2631_v26 = vsub.f32 1.0, %v3660_v16  ;;  %v2637_v30 = vmul.f32 %v3660_v16, %v2534_v7 }
0x307c   : > { %v2622_v1 = vpop.permute.xlu1 %2621 }
0x307d   : > { %v2624_v13 = vmul.f32 %v3660_v16, %v2622_v1 }
0x307f   : > { %2626 = vrot.lane.b32.xlu0 %v2624_v13, %s3730_s21  ;;  %s3003_s21 = sshll.u32 %s3800_s9, 7 }
0x3080   : > { %s4290_s12 = scalar_lea.hbm %s4342_s8, %s3003_s21 }
0x30f1   : > { %v2627_v19 = vpop.permute.xlu0 %2626 }
0x30f2   : > { %v2629_v28 = vadd.f32 %v2627_v19, %v4132_v17 }
0x30f4   : > { %3661 = vtanh.f32 %v2629_v28 }
0x30fe   : > { %v3662_v20 = vpop.eup %3661 }
0x30ff   : > { %2633 = vrot.lane.b32.xlu1 %v3662_v20, %s3731_s24 }
0x3171   : > { %v2634_v27 = vpop.permute.xlu1 %2633 }
0x3172   : > { %v2636_v31 = vmul.f32 %v2634_v27, %v2631_v26 }
0x3174   : > { %v2638_v32 = vadd.f32 %v2637_v30, %v2636_v31 }
0x3176   : > { %2640 = vrot.lane.b32.xlu0 %v2638_v32, %s3731_s24  ;;  %s3733_s24 = smov [#allocation3]  }
0x3177   : > { %s3667_s22 = sshll.u32 %s3733_s24, 4  ;;  %s3668_s22 = int_to_ptr.vmem [resolvable:$false] %s3667_s22 }
0x3178   : > { %s3669_s0 = scalar_lea.vmem %s3668_s22, 256  ;;  %p3670_p2 = scmp.lt.s32.totalorder %s2822_s23, %s3668_s22 }
0x3179   : > { %p3671_p3 = scmp.lt.s32.totalorder %s3669_s0, %s3663_s18 }
0x317b   : > { %p3672_p4 = por %p3671_p3, %p3670_p2 }
0x317d   : > { %p3673_p7 = pnand %p3672_p4, %p3666_p1 }
0x31e8   : > { %v2641_v33 = vpop.permute.xlu0 %2640 }
0x31e9   : > { %2643 = vst.msk [vmem:[#allocation2 + $0x38] sm:$0xff] %vm525_vm3, %v2641_v33 }
0x31f0   : > { %v2656_v34 = vld [vmem:[#allocation2 + $0x38] sm:$0xff] }
0x31f1   : > { %3382 = vmatmul.mubr.msk.f32.gmra.mrb[28].mxu0 %vm525_vm3, %v2656_v34 }
0x31f2   : > { %3676 = shalt.err (!%p3673_p7)
}
0x31f3   : > { %s3677_s9 = scalar_lea.hbm %s4290_s12, 128  ;;  %s3681_s17 = scalar_lea.hbm %s4342_s8, 256 }
0x31f4   : > { %p3678_p8 = scmp.ne.s32.totalorder %s4290_s12, %s3677_s9  ;;  %p3682_p11 = scmp.lt.u32.totalorder %s4290_s12, %s4342_s8 }
0x31f5   : > { %p3683_p12 = scmp.lt.u32.totalorder %s3681_s17, %s3677_s9  ;;  %p3685_p0 = scmp.lt.u32.totalorder %s3677_s9, %s4290_s12 }
0x31f6   : > { %p3679_p9 = pnand %p3678_p8, %p3817_p5 }
0x31f7   : > { %p3684_p13 = por %p3683_p12, %p3682_p11 }
0x31f8   : > { %p3680_p10 = pneg %p3679_p9 }
0x31f9   : > { %p3686_p1 = por %p3685_p0, %p3684_p13 }
0x31fb   : > { %p3687_p2 = pnand %p3686_p1, %p3680_p10 }
0x31fd   : > { %3690 = shalt.err (!%p3687_p2)
}
0x31fe   : > { %3508 = dma.vmem_to_hbm [thread:$0]  (%p3817_p5), %s2822_s23, 128, %s4290_s12, %s2804_s13  }
0x32c4   : > { %v3383_v17 = vpop.f32.mrb[28].mxu0 }
0x32c5   : > { %v2787_v35 = vadd.f32 %v3383_v17, %v4241_v47  ;;  %v2781_v36 = vpop.f32.mrb[29].mxu0 }
0x32c6   : > { %v2782_v37 = vadd.f32 %v4241_v47, %v2781_v36 }
0x32c7   : > { %2797 = vst.msk [vmem:[%s4246_s19 + $0x38] sm:$0xff] %vm375_vm1, %v2787_v35 }
0x32c8   : > { %2796 = vst.msk [vmem:[%s4246_s19 + $0x30] sm:$0xff] %vm375_vm1, %v2782_v37 }
0x32c9 PF: > { %p3514_p3 = scmp.ge.s32.totalorder %s3725_s30, 2  ;;  %s2841_s0 = sand.u32 1, %s3713_s27  }
0x32ca   : > { %s2842_s15 = scalar_lea.sflag [#allocation4], %s2841_s0 }
0x32cb   : > { %p3511_p4 = pnand %p3514_p3, %p3821_p6 }
0x32cd   : > { %3708 = dma.done.wait (!%p3511_p4), %s2842_s15, 128  }
0x32ce   : > { %3710 = vsyncadd (!%p3511_p4), %s2842_s15, 4294967168  ;;  %p19_p5 = scmp.ge.s32.totalorder %s3804_s11, 4   ;;  %s4347_s27 = smov %s3717_s28 }
0x32cf   : > { %s4348_s28 = smov %s3721_s29  ;;  %s4349_s29 = smov %s3815_s14 }
0x32d0   : > { %s4350_s30 = smov %s3804_s11  ;;  %21 = sbr.rel (!%p19_p5) target bundleno = 5 (0x5), region = 101 }
0x32d7   :  { %2847 = vsyncpa [#allocation4], 1 }
0x32d8   :  { %2849 = vsyncpa [#allocation4 + $0x1], 1 }

</bundles_post_ra>
